<compile_context>
chip_gen: v7x
topology: tpu7x:2x2x1
jax: 0.10.0
libtpu: 0.0.40
codegen_flags: <defaults>
</compile_context>

<pallas_src>
import jax
import jax.numpy as jnp
from jax import lax
from jax.experimental import pallas as pl
from jax.experimental.pallas import tpu as pltpu


def _sigmoid(x):
    # Stable sigmoid routed through tanh (EUP) instead of a VALU divide chain.
    return 0.5 * (jnp.tanh(0.5 * x) + 1.0)


def attn_decoder_kernel(
    emb_ref,                       # (T, H)  pre-gathered embedding rows (one per token)
    hid0_ref,                      # (1, H)  initial hidden state
    enc_ref,                       # (L, H)  encoder outputs
    w_emb_ref,                     # (H, L+H)   [attn_we | comb_we]
    w_h_ref,                       # (H, L+3H)  [attn_wh | W_hr | W_hz | W_hn]
    w_x_ref,                       # (H, 3H)    [W_ir | W_iz | W_in]
    comb_wa_ref,                   # (H, H)     attn_combine weight for attn_applied part
    attn_b_ref,                    # (1, L)
    comb_b_ref,                    # (1, H)
    b_r_ref, b_z_ref, b_in_ref, b_hn_ref,   # (1, H) each
    outw_ref, outb_ref,            # (H, V), (1, V)
    logp_ref,                      # out (T, V)
    newh_ref,                      # out (1, H)
    attnw_ref,                     # out (T, L)
    hs_ref,                        # VMEM scratch (T, H): per-step hidden states
):
    T, H = emb_ref.shape
    L = enc_ref.shape[0]

    def step(t, h):
        emb = emb_ref[pl.ds(t, 1), :]                       # (1, H)
        # TODO(synk): nn.Dropout(p=0.1) on `embedded` omitted — eval-mode identity.

        # Fused projections of emb and h (single MXU launch per operand).
        emb_proj = jnp.dot(emb, w_emb_ref[...],
                           preferred_element_type=jnp.float32)          # (1, L+H)
        h_proj = jnp.dot(h, w_h_ref[...],
                         preferred_element_type=jnp.float32)            # (1, L+3H)

        # attn_weights = softmax(Linear(2H->L)(cat(emb, h)))  -- exact normalization.
        attn_logits = emb_proj[:, :L] + h_proj[:, :L] + attn_b_ref[...]  # (1, L)
        m = jnp.max(attn_logits, axis=-1, keepdims=True)
        e = jnp.exp(attn_logits - m)
        attn_w = e / jnp.sum(e, axis=-1, keepdims=True)
        attnw_ref[pl.ds(t, 1), :] = attn_w

        # attn_applied = bmm(attn_weights, encoder_outputs)
        attn_applied = jnp.dot(attn_w, enc_ref[...],
                               preferred_element_type=jnp.float32)       # (1, H)

        # attn_combine(cat(emb, attn_applied)), then ReLU
        combined = (emb_proj[:, L:] + comb_b_ref[...]
                    + jnp.dot(attn_applied, comb_wa_ref[...],
                              preferred_element_type=jnp.float32))       # (1, H)
        x = jnp.maximum(combined, 0.0)

        # GRU cell (PyTorch gate order r, z, n); fused x projection, gates sliced.
        x_proj = jnp.dot(x, w_x_ref[...],
                         preferred_element_type=jnp.float32)             # (1, 3H)
        hr = h_proj[:, L:L + H]
        hz = h_proj[:, L + H:L + 2 * H]
        hn = h_proj[:, L + 2 * H:L + 3 * H]
        r = _sigmoid(x_proj[:, 0:H] + hr + b_r_ref[...])
        z = _sigmoid(x_proj[:, H:2 * H] + hz + b_z_ref[...])
        n = jnp.tanh(x_proj[:, 2 * H:3 * H] + b_in_ref[...] + r * (hn + b_hn_ref[...]))
        h_new = (1.0 - z) * n + z * h

        hs_ref[pl.ds(t, 1), :] = h_new
        return h_new

    h_final = lax.fori_loop(0, T, step, hid0_ref[...], unroll=True)
    newh_ref[...] = h_final

    # Hoisted, batched output projection + log_softmax: one (T,H)@(H,V) matmul and a
    # single dense (T,V) store instead of T tiny masked stores.
    logits = jnp.dot(hs_ref[...], outw_ref[...],
                     preferred_element_type=jnp.float32) + outb_ref[...]  # (T, V)
    lm = jnp.max(logits, axis=-1, keepdims=True)
    shifted = logits - lm
    lse = jnp.log(jnp.sum(jnp.exp(shifted), axis=-1, keepdims=True))
    logp_ref[...] = shifted - lse


# --------------------------------------------------------------------------------------
# Parameter construction / layout conversion
# --------------------------------------------------------------------------------------

def make_torch_style_params(key, H, V, L):
    """Parameters in native PyTorch layout (Linear weight = (out_features, in_features))."""
    ks = jax.random.split(key, 11)
    s = 0.1
    return dict(
        embedding=jax.random.normal(ks[0], (V, H), jnp.float32) * s,   # nn.Embedding.weight
        attn_w=jax.random.normal(ks[1], (L, 2 * H), jnp.float32) * s,  # attn.weight
        attn_b=jax.random.normal(ks[2], (L,), jnp.float32) * s,
        comb_w=jax.random.normal(ks[3], (H, 2 * H), jnp.float32) * s,  # attn_combine.weight
        comb_b=jax.random.normal(ks[4], (H,), jnp.float32) * s,
        w_ih=jax.random.normal(ks[5], (3 * H, H), jnp.float32) * s,    # gru.weight_ih_l0 (r|z|n)
        w_hh=jax.random.normal(ks[6], (3 * H, H), jnp.float32) * s,    # gru.weight_hh_l0
        b_ih=jax.random.normal(ks[7], (3 * H,), jnp.float32) * s,
        b_hh=jax.random.normal(ks[8], (3 * H,), jnp.float32) * s,
        out_w=jax.random.normal(ks[9], (V, H), jnp.float32) * s,       # out.weight
        out_b=jax.random.normal(ks[10], (V,), jnp.float32) * s,
    )


def prepare_kernel_params(tp, H, V, L):
    """Kernel layout: (in,out)-transposed linears, fused per-operand weight blocks."""
    aw = tp["attn_w"].T            # (2H, L)
    cw = tp["comb_w"].T            # (2H, H)
    wih = tp["w_ih"].T             # (H, 3H), columns ordered r|z|n
    whh = tp["w_hh"].T             # (H, 3H)
    b_ih, b_hh = tp["b_ih"], tp["b_hh"]
    attn_we, attn_wh = aw[:H, :], aw[H:, :]
    comb_we, comb_wa = cw[:H, :], cw[H:, :]
    return dict(
        hidden_size=H, output_size=V, max_length=L,
        embedding=tp["embedding"],
        w_emb=jnp.concatenate([attn_we, comb_we], axis=1),    # (H, L+H)
        w_h=jnp.concatenate([attn_wh, whh], axis=1),          # (H, L+3H): attn | r | z | n
        w_x=wih,                                              # (H, 3H): r | z | n
        comb_wa=comb_wa,                                      # (H, H)
        attn_b=tp["attn_b"].reshape(1, L),
        comb_b=tp["comb_b"].reshape(1, H),
        b_r=(b_ih[0:H] + b_hh[0:H]).reshape(1, H),
        b_z=(b_ih[H:2 * H] + b_hh[H:2 * H]).reshape(1, H),
        b_in=b_ih[2 * H:3 * H].reshape(1, H),
        b_hn=b_hh[2 * H:3 * H].reshape(1, H),
        out_w=tp["out_w"].T,                                  # (H, V)
        out_b=tp["out_b"].reshape(1, V),
    )


_WEIGHT_NAMES = (
    "w_emb", "w_h", "w_x", "comb_wa",
    "attn_b", "comb_b", "b_r", "b_z", "b_in", "b_hn",
    "out_w", "out_b",
)


# --------------------------------------------------------------------------------------
# Wrappers
# --------------------------------------------------------------------------------------

def attn_decoder_decode(params, tokens, hidden0, encoder_outputs):
    """Fused T-step decode (teacher-forced token sequence) in a single pallas_call.

    tokens: (T,) int32; hidden0: (1,1,H); encoder_outputs: (L,H).
    Returns (log_probs (T,V), final hidden (1,1,H), attn_weights (T,L)).
    """
    H, V, L = params["hidden_size"], params["output_size"], params["max_length"]
    T = int(tokens.shape[0])

    # Pre-gather embedding rows in the wrapper: one resident (T,H) input instead of
    # T per-step row DMAs inside the kernel.
    emb = jnp.take(params["embedding"], tokens.astype(jnp.int32), axis=0)
    hid2d = hidden0.reshape(1, H).astype(jnp.float32)
    enc = encoder_outputs.astype(jnp.float32)
    weights = [params[n] for n in _WEIGHT_NAMES]

    logp, new_h, attn_w = pl.pallas_call(
        attn_decoder_kernel,
        out_shape=(
            jax.ShapeDtypeStruct((T, V), jnp.float32),
            jax.ShapeDtypeStruct((1, H), jnp.float32),
            jax.ShapeDtypeStruct((T, L), jnp.float32),
        ),
        # No grid: every input is DMA'd HBM->VMEM exactly once and stays resident;
        # the recurrence runs as an in-kernel fori_loop.
        scratch_shapes=[pltpu.VMEM((T, H), jnp.float32)],
    )(emb, hid2d, enc, *weights)

    return logp, new_h.reshape(1, 1, H), attn_w


def attn_decoder_forward(params, input_idx, hidden, encoder_outputs):
    """Single-step call matching the PyTorch AttnDecoderRNN.forward signature."""
    tokens = jnp.asarray(input_idx, jnp.int32).reshape(1)
    logp, new_h, attn_w = attn_decoder_decode(params, tokens, hidden, encoder_outputs)
    return logp, new_h, attn_w      # (1,V), (1,1,H), (1,L)


# --------------------------------------------------------------------------------------
# Pure-JAX reference (PyTorch-layout params) for correctness checking
# --------------------------------------------------------------------------------------

def attn_decoder_reference(tp, tokens, hidden0, encoder_outputs, H):
    h = hidden0.reshape(1, H).astype(jnp.float32)
    logps, attns = [], []
    for t in range(int(tokens.shape[0])):
        embedded = tp["embedding"][tokens[t]].reshape(1, H)
        cat_eh = jnp.concatenate([embedded, h], axis=1)
        attn_w = jax.nn.softmax(cat_eh @ tp["attn_w"].T + tp["attn_b"], axis=-1)
        attn_applied = attn_w @ encoder_outputs
        comb = jnp.concatenate([embedded, attn_applied], axis=1) @ tp["comb_w"].T + tp["comb_b"]
        x = jax.nn.relu(comb)
        gi = x @ tp["w_ih"].T + tp["b_ih"]
        gh = h @ tp["w_hh"].T + tp["b_hh"]
        r = jax.nn.sigmoid(gi[:, 0:H] + gh[:, 0:H])
        z = jax.nn.sigmoid(gi[:, H:2 * H] + gh[:, H:2 * H])
        n = jnp.tanh(gi[:, 2 * H:] + r * gh[:, 2 * H:])
        h = (1.0 - z) * n + z * h
        logits = h @ tp["out_w"].T + tp["out_b"]
        logps.append(jax.nn.log_softmax(logits, axis=-1))
        attns.append(attn_w)
    return jnp.concatenate(logps, 0), h.reshape(1, 1, H), jnp.concatenate(attns, 0)


# --------------------------------------------------------------------------------------

if __name__ == "__main__":
    HIDDEN = 32     # hidden_size
    VOCAB = 48      # output_size
    MAXLEN = 8      # max_length
    T = 6           # number of fused decode steps

    key = jax.random.PRNGKey(0)
    kp, ke, kt = jax.random.split(key, 3)
    torch_params = make_torch_style_params(kp, HIDDEN, VOCAB, MAXLEN)
    params = prepare_kernel_params(torch_params, HIDDEN, VOCAB, MAXLEN)

    tokens = jax.random.randint(kt, (T,), 0, VOCAB, dtype=jnp.int32)
    hidden0 = jnp.zeros((1, 1, HIDDEN), jnp.float32)              # initHidden()
    encoder_outputs = jax.random.normal(ke, (MAXLEN, HIDDEN), jnp.float32)

    # Fused multi-token decode: single pallas_call, single grid step.
    logp, hid, attn_w = attn_decoder_decode(params, tokens, hidden0, encoder_outputs)
    jax.block_until_ready((logp, hid, attn_w))

    # Single-step call (original module signature).
    logp1, hid1, attn1 = attn_decoder_forward(params, tokens[0], hidden0, encoder_outputs)
    jax.block_until_ready((logp1, hid1, attn1))

    assert logp.shape == (T, VOCAB)
    assert hid.shape == (1, 1, HIDDEN)
    assert attn_w.shape == (T, MAXLEN)
    assert logp1.shape == (1, VOCAB)
    assert hid1.shape == (1, 1, HIDDEN)
    assert attn1.shape == (1, MAXLEN)
    assert bool(jnp.all(jnp.isfinite(logp))) and bool(jnp.all(jnp.isfinite(hid)))
    assert bool(jnp.all(jnp.isfinite(attn_w)))

    # Exact softmax normalization -> tight row-sum checks.
    assert bool(jnp.all(jnp.abs(jnp.sum(attn_w, axis=-1) - 1.0) < 1e-4))
    assert bool(jnp.all(jnp.abs(jnp.sum(jnp.exp(logp), axis=-1) - 1.0) < 1e-4))

    # Step 0 of the fused decode agrees with the single-step call.
    assert float(jnp.max(jnp.abs(logp[0:1] - logp1))) < 1e-4
    assert float(jnp.max(jnp.abs(attn_w[0:1] - attn1))) < 1e-4

    # Compare against an independent pure-JAX reference in PyTorch layout.
    # (Tolerances account for TPU default matmul precision on both paths.)
    ref_logp, ref_hid, ref_attn = attn_decoder_reference(
        torch_params, tokens, hidden0, encoder_outputs, HIDDEN)
    assert float(jnp.max(jnp.abs(logp - ref_logp))) < 2e-2
    assert float(jnp.max(jnp.abs(attn_w - ref_attn))) < 1e-2
    assert float(jnp.max(jnp.abs(hid - ref_hid))) < 1e-2

    print("KERNEL_OK")
</pallas_src>

<mosaic_0001>
module attributes {stable_mosaic.version = 11 : i64} {
  func.func @attn_decoder_kernel(%arg0: memref<6x32xf32, #tpu.memory_space<vmem>>, %arg1: memref<1x32xf32, #tpu.memory_space<vmem>>, %arg2: memref<8x32xf32, #tpu.memory_space<vmem>>, %arg3: memref<32x40xf32, #tpu.memory_space<vmem>>, %arg4: memref<32x104xf32, #tpu.memory_space<vmem>>, %arg5: memref<32x96xf32, #tpu.memory_space<vmem>>, %arg6: memref<32x32xf32, #tpu.memory_space<vmem>>, %arg7: memref<1x8xf32, #tpu.memory_space<vmem>>, %arg8: memref<1x32xf32, #tpu.memory_space<vmem>>, %arg9: memref<1x32xf32, #tpu.memory_space<vmem>>, %arg10: memref<1x32xf32, #tpu.memory_space<vmem>>, %arg11: memref<1x32xf32, #tpu.memory_space<vmem>>, %arg12: memref<1x32xf32, #tpu.memory_space<vmem>>, %arg13: memref<32x48xf32, #tpu.memory_space<vmem>>, %arg14: memref<1x48xf32, #tpu.memory_space<vmem>>, %arg15: memref<6x48xf32, #tpu.memory_space<vmem>>, %arg16: memref<1x32xf32, #tpu.memory_space<vmem>>, %arg17: memref<6x8xf32, #tpu.memory_space<vmem>>, %arg18: memref<6x32xf32, #tpu.memory_space<vmem>>) attributes {dimension_semantics = [], scalar_prefetch = 0 : i64, scratch_operands = 1 : i64, tpu.core_type = #tpu.core_type<tc>} {
    %c0 = arith.constant 0 : index
    %c0_0 = arith.constant 0 : index
    %0 = vector.load %arg1[%c0, %c0_0] : memref<1x32xf32, #tpu.memory_space<vmem>>, vector<1x32xf32>
    %c0_i32 = arith.constant 0 : i32
    %1 = arith.index_cast %c0_i32 : i32 to index
    %c0_1 = arith.constant 0 : index
    %2 = vector.load %arg0[%1, %c0_1] : memref<6x32xf32, #tpu.memory_space<vmem>>, vector<1x32xf32>
    %c0_2 = arith.constant 0 : index
    %c0_3 = arith.constant 0 : index
    %3 = vector.load %arg3[%c0_2, %c0_3] : memref<32x40xf32, #tpu.memory_space<vmem>>, vector<32x40xf32>
    %cst = arith.constant dense<0.000000e+00> : vector<1x40xf32>
    %4 = tpu.matmul %2, %3, %cst {dimension_numbers = #tpu.dot_dimension_numbers<[1], [0], [0], [1], [0, 0, 1, 1], [], []>} : vector<1x32xf32>, vector<32x40xf32>, vector<1x40xf32> -> vector<1x40xf32>
    %c0_4 = arith.constant 0 : index
    %c0_5 = arith.constant 0 : index
    %5 = vector.load %arg4[%c0_4, %c0_5] : memref<32x104xf32, #tpu.memory_space<vmem>>, vector<32x104xf32>
    %cst_6 = arith.constant dense<0.000000e+00> : vector<1x104xf32>
    %6 = tpu.matmul %0, %5, %cst_6 {dimension_numbers = #tpu.dot_dimension_numbers<[1], [0], [0], [1], [0, 0, 1, 1], [], []>} : vector<1x32xf32>, vector<32x104xf32>, vector<1x104xf32> -> vector<1x104xf32>
    %7 = vector.extract_strided_slice %4 {offsets = [0, 0], sizes = [1, 8], strides = [1, 1]} : vector<1x40xf32> to vector<1x8xf32>
    %8 = vector.extract_strided_slice %6 {offsets = [0, 0], sizes = [1, 8], strides = [1, 1]} : vector<1x104xf32> to vector<1x8xf32>
    %9 = arith.addf %7, %8 : vector<1x8xf32>
    %c0_7 = arith.constant 0 : index
    %c0_8 = arith.constant 0 : index
    %10 = vector.load %arg7[%c0_7, %c0_8] : memref<1x8xf32, #tpu.memory_space<vmem>>, vector<1x8xf32>
    %11 = arith.addf %9, %10 : vector<1x8xf32>
    %cst_9 = arith.constant dense<0xFF800000> : vector<1xf32>
    %12 = vector.multi_reduction <maximumf>, %11, %cst_9 [1] : vector<1x8xf32> to vector<1xf32>
    %13 = vector.shape_cast %12 : vector<1xf32> to vector<1x1xf32>
    %14 = vector.broadcast %13 : vector<1x1xf32> to vector<1x8xf32>
    %15 = arith.subf %11, %14 : vector<1x8xf32>
    %16 = math.exp %15 : vector<1x8xf32>
    %cst_10 = arith.constant dense<0.000000e+00> : vector<1xf32>
    %17 = vector.multi_reduction <add>, %16, %cst_10 [1] : vector<1x8xf32> to vector<1xf32>
    %18 = vector.shape_cast %17 : vector<1xf32> to vector<1x1xf32>
    %19 = vector.broadcast %18 : vector<1x1xf32> to vector<1x8xf32>
    %20 = arith.divf %16, %19 : vector<1x8xf32>
    %21 = arith.index_cast %c0_i32 : i32 to index
    %c0_11 = arith.constant 0 : index
    %22 = vector.load %arg17[%21, %c0_11] : memref<6x8xf32, #tpu.memory_space<vmem>>, vector<1x8xf32>
    tpu.vector_store %arg17[%21, %c0_11], %20 {strides = array<i32>} : memref<6x8xf32, #tpu.memory_space<vmem>>, vector<1x8xf32>,
    %c0_12 = arith.constant 0 : index
    %c0_13 = arith.constant 0 : index
    %23 = vector.load %arg2[%c0_12, %c0_13] : memref<8x32xf32, #tpu.memory_space<vmem>>, vector<8x32xf32>
    %cst_14 = arith.constant dense<0.000000e+00> : vector<1x32xf32>
    %24 = tpu.matmul %20, %23, %cst_14 {dimension_numbers = #tpu.dot_dimension_numbers<[1], [0], [0], [1], [0, 0, 1, 1], [], []>} : vector<1x8xf32>, vector<8x32xf32>, vector<1x32xf32> -> vector<1x32xf32>
    %25 = vector.extract_strided_slice %4 {offsets = [0, 8], sizes = [1, 32], strides = [1, 1]} : vector<1x40xf32> to vector<1x32xf32>
    %c0_15 = arith.constant 0 : index
    %c0_16 = arith.constant 0 : index
    %26 = vector.load %arg8[%c0_15, %c0_16] : memref<1x32xf32, #tpu.memory_space<vmem>>, vector<1x32xf32>
    %27 = arith.addf %25, %26 : vector<1x32xf32>
    %c0_17 = arith.constant 0 : index
    %c0_18 = arith.constant 0 : index
    %28 = vector.load %arg6[%c0_17, %c0_18] : memref<32x32xf32, #tpu.memory_space<vmem>>, vector<32x32xf32>
    %cst_19 = arith.constant dense<0.000000e+00> : vector<1x32xf32>
    %29 = tpu.matmul %24, %28, %cst_19 {dimension_numbers = #tpu.dot_dimension_numbers<[1], [0], [0], [1], [0, 0, 1, 1], [], []>} : vector<1x32xf32>, vector<32x32xf32>, vector<1x32xf32> -> vector<1x32xf32>
    %30 = arith.addf %27, %29 : vector<1x32xf32>
    %cst_20 = arith.constant 0.000000e+00 : f32
    %31 = vector.broadcast %cst_20 : f32 to vector<1x32xf32>
    %32 = arith.maximumf %30, %31 : vector<1x32xf32>
    %c0_21 = arith.constant 0 : index
    %c0_22 = arith.constant 0 : index
    %33 = vector.load %arg5[%c0_21, %c0_22] : memref<32x96xf32, #tpu.memory_space<vmem>>, vector<32x96xf32>
    %cst_23 = arith.constant dense<0.000000e+00> : vector<1x96xf32>
    %34 = tpu.matmul %32, %33, %cst_23 {dimension_numbers = #tpu.dot_dimension_numbers<[1], [0], [0], [1], [0, 0, 1, 1], [], []>} : vector<1x32xf32>, vector<32x96xf32>, vector<1x96xf32> -> vector<1x96xf32>
    %35 = vector.extract_strided_slice %6 {offsets = [0, 8], sizes = [1, 32], strides = [1, 1]} : vector<1x104xf32> to vector<1x32xf32>
    %36 = vector.extract_strided_slice %6 {offsets = [0, 40], sizes = [1, 32], strides = [1, 1]} : vector<1x104xf32> to vector<1x32xf32>
    %37 = vector.extract_strided_slice %6 {offsets = [0, 72], sizes = [1, 32], strides = [1, 1]} : vector<1x104xf32> to vector<1x32xf32>
    %38 = vector.extract_strided_slice %34 {offsets = [0, 0], sizes = [1, 32], strides = [1, 1]} : vector<1x96xf32> to vector<1x32xf32>
    %39 = arith.addf %38, %35 : vector<1x32xf32>
    %c0_24 = arith.constant 0 : index
    %c0_25 = arith.constant 0 : index
    %40 = vector.load %arg9[%c0_24, %c0_25] : memref<1x32xf32, #tpu.memory_space<vmem>>, vector<1x32xf32>
    %41 = arith.addf %39, %40 : vector<1x32xf32>
    %cst_26 = arith.constant 5.000000e-01 : f32
    %42 = vector.broadcast %cst_26 : f32 to vector<1x32xf32>
    %43 = arith.mulf %42, %41 : vector<1x32xf32>
    %44 = math.tanh %43 : vector<1x32xf32>
    %cst_27 = arith.constant 1.000000e+00 : f32
    %45 = vector.broadcast %cst_27 : f32 to vector<1x32xf32>
    %46 = arith.addf %44, %45 : vector<1x32xf32>
    %cst_28 = arith.constant 5.000000e-01 : f32
    %47 = vector.broadcast %cst_28 : f32 to vector<1x32xf32>
    %48 = arith.mulf %47, %46 : vector<1x32xf32>
    %49 = vector.extract_strided_slice %34 {offsets = [0, 32], sizes = [1, 32], strides = [1, 1]} : vector<1x96xf32> to vector<1x32xf32>
    %50 = arith.addf %49, %36 : vector<1x32xf32>
    %c0_29 = arith.constant 0 : index
    %c0_30 = arith.constant 0 : index
    %51 = vector.load %arg10[%c0_29, %c0_30] : memref<1x32xf32, #tpu.memory_space<vmem>>, vector<1x32xf32>
    %52 = arith.addf %50, %51 : vector<1x32xf32>
    %cst_31 = arith.constant 5.000000e-01 : f32
    %53 = vector.broadcast %cst_31 : f32 to vector<1x32xf32>
    %54 = arith.mulf %53, %52 : vector<1x32xf32>
    %55 = math.tanh %54 : vector<1x32xf32>
    %cst_32 = arith.constant 1.000000e+00 : f32
    %56 = vector.broadcast %cst_32 : f32 to vector<1x32xf32>
    %57 = arith.addf %55, %56 : vector<1x32xf32>
    %cst_33 = arith.constant 5.000000e-01 : f32
    %58 = vector.broadcast %cst_33 : f32 to vector<1x32xf32>
    %59 = arith.mulf %58, %57 : vector<1x32xf32>
    %60 = vector.extract_strided_slice %34 {offsets = [0, 64], sizes = [1, 32], strides = [1, 1]} : vector<1x96xf32> to vector<1x32xf32>
    %c0_34 = arith.constant 0 : index
    %c0_35 = arith.constant 0 : index
    %61 = vector.load %arg11[%c0_34, %c0_35] : memref<1x32xf32, #tpu.memory_space<vmem>>, vector<1x32xf32>
    %62 = arith.addf %60, %61 : vector<1x32xf32>
    %c0_36 = arith.constant 0 : index
    %c0_37 = arith.constant 0 : index
    %63 = vector.load %arg12[%c0_36, %c0_37] : memref<1x32xf32, #tpu.memory_space<vmem>>, vector<1x32xf32>
    %64 = arith.addf %37, %63 : vector<1x32xf32>
    %65 = arith.mulf %48, %64 : vector<1x32xf32>
    %66 = arith.addf %62, %65 : vector<1x32xf32>
    %67 = math.tanh %66 : vector<1x32xf32>
    %cst_38 = arith.constant 1.000000e+00 : f32
    %68 = vector.broadcast %cst_38 : f32 to vector<1x32xf32>
    %69 = arith.subf %68, %59 : vector<1x32xf32>
    %70 = arith.mulf %69, %67 : vector<1x32xf32>
    %71 = arith.mulf %59, %0 : vector<1x32xf32>
    %72 = arith.addf %70, %71 : vector<1x32xf32>
    %73 = arith.index_cast %c0_i32 : i32 to index
    %c0_39 = arith.constant 0 : index
    %74 = vector.load %arg18[%73, %c0_39] : memref<6x32xf32, #tpu.memory_space<vmem>>, vector<1x32xf32>
    tpu.vector_store %arg18[%73, %c0_39], %72 {strides = array<i32>} : memref<6x32xf32, #tpu.memory_space<vmem>>, vector<1x32xf32>,
    %c1_i32 = arith.constant 1 : i32
    %75 = arith.index_cast %c1_i32 : i32 to index
    %c0_40 = arith.constant 0 : index
    %76 = vector.load %arg0[%75, %c0_40] : memref<6x32xf32, #tpu.memory_space<vmem>>, vector<1x32xf32>
    %c0_41 = arith.constant 0 : index
    %c0_42 = arith.constant 0 : index
    %77 = vector.load %arg3[%c0_41, %c0_42] : memref<32x40xf32, #tpu.memory_space<vmem>>, vector<32x40xf32>
    %cst_43 = arith.constant dense<0.000000e+00> : vector<1x40xf32>
    %78 = tpu.matmul %76, %77, %cst_43 {dimension_numbers = #tpu.dot_dimension_numbers<[1], [0], [0], [1], [0, 0, 1, 1], [], []>} : vector<1x32xf32>, vector<32x40xf32>, vector<1x40xf32> -> vector<1x40xf32>
    %c0_44 = arith.constant 0 : index
    %c0_45 = arith.constant 0 : index
    %79 = vector.load %arg4[%c0_44, %c0_45] : memref<32x104xf32, #tpu.memory_space<vmem>>, vector<32x104xf32>
    %cst_46 = arith.constant dense<0.000000e+00> : vector<1x104xf32>
    %80 = tpu.matmul %72, %79, %cst_46 {dimension_numbers = #tpu.dot_dimension_numbers<[1], [0], [0], [1], [0, 0, 1, 1], [], []>} : vector<1x32xf32>, vector<32x104xf32>, vector<1x104xf32> -> vector<1x104xf32>
    %81 = vector.extract_strided_slice %78 {offsets = [0, 0], sizes = [1, 8], strides = [1, 1]} : vector<1x40xf32> to vector<1x8xf32>
    %82 = vector.extract_strided_slice %80 {offsets = [0, 0], sizes = [1, 8], strides = [1, 1]} : vector<1x104xf32> to vector<1x8xf32>
    %83 = arith.addf %81, %82 : vector<1x8xf32>
    %c0_47 = arith.constant 0 : index
    %c0_48 = arith.constant 0 : index
    %84 = vector.load %arg7[%c0_47, %c0_48] : memref<1x8xf32, #tpu.memory_space<vmem>>, vector<1x8xf32>
    %85 = arith.addf %83, %84 : vector<1x8xf32>
    %cst_49 = arith.constant dense<0xFF800000> : vector<1xf32>
    %86 = vector.multi_reduction <maximumf>, %85, %cst_49 [1] : vector<1x8xf32> to vector<1xf32>
    %87 = vector.shape_cast %86 : vector<1xf32> to vector<1x1xf32>
    %88 = vector.broadcast %87 : vector<1x1xf32> to vector<1x8xf32>
    %89 = arith.subf %85, %88 : vector<1x8xf32>
    %90 = math.exp %89 : vector<1x8xf32>
    %cst_50 = arith.constant dense<0.000000e+00> : vector<1xf32>
    %91 = vector.multi_reduction <add>, %90, %cst_50 [1] : vector<1x8xf32> to vector<1xf32>
    %92 = vector.shape_cast %91 : vector<1xf32> to vector<1x1xf32>
    %93 = vector.broadcast %92 : vector<1x1xf32> to vector<1x8xf32>
    %94 = arith.divf %90, %93 : vector<1x8xf32>
    %95 = arith.index_cast %c1_i32 : i32 to index
    %c0_51 = arith.constant 0 : index
    %96 = vector.load %arg17[%95, %c0_51] : memref<6x8xf32, #tpu.memory_space<vmem>>, vector<1x8xf32>
    tpu.vector_store %arg17[%95, %c0_51], %94 {strides = array<i32>} : memref<6x8xf32, #tpu.memory_space<vmem>>, vector<1x8xf32>,
    %c0_52 = arith.constant 0 : index
    %c0_53 = arith.constant 0 : index
    %97 = vector.load %arg2[%c0_52, %c0_53] : memref<8x32xf32, #tpu.memory_space<vmem>>, vector<8x32xf32>
    %cst_54 = arith.constant dense<0.000000e+00> : vector<1x32xf32>
    %98 = tpu.matmul %94, %97, %cst_54 {dimension_numbers = #tpu.dot_dimension_numbers<[1], [0], [0], [1], [0, 0, 1, 1], [], []>} : vector<1x8xf32>, vector<8x32xf32>, vector<1x32xf32> -> vector<1x32xf32>
    %99 = vector.extract_strided_slice %78 {offsets = [0, 8], sizes = [1, 32], strides = [1, 1]} : vector<1x40xf32> to vector<1x32xf32>
    %c0_55 = arith.constant 0 : index
    %c0_56 = arith.constant 0 : index
    %100 = vector.load %arg8[%c0_55, %c0_56] : memref<1x32xf32, #tpu.memory_space<vmem>>, vector<1x32xf32>
    %101 = arith.addf %99, %100 : vector<1x32xf32>
    %c0_57 = arith.constant 0 : index
    %c0_58 = arith.constant 0 : index
    %102 = vector.load %arg6[%c0_57, %c0_58] : memref<32x32xf32, #tpu.memory_space<vmem>>, vector<32x32xf32>
    %cst_59 = arith.constant dense<0.000000e+00> : vector<1x32xf32>
    %103 = tpu.matmul %98, %102, %cst_59 {dimension_numbers = #tpu.dot_dimension_numbers<[1], [0], [0], [1], [0, 0, 1, 1], [], []>} : vector<1x32xf32>, vector<32x32xf32>, vector<1x32xf32> -> vector<1x32xf32>
    %104 = arith.addf %101, %103 : vector<1x32xf32>
    %cst_60 = arith.constant 0.000000e+00 : f32
    %105 = vector.broadcast %cst_60 : f32 to vector<1x32xf32>
    %106 = arith.maximumf %104, %105 : vector<1x32xf32>
    %c0_61 = arith.constant 0 : index
    %c0_62 = arith.constant 0 : index
    %107 = vector.load %arg5[%c0_61, %c0_62] : memref<32x96xf32, #tpu.memory_space<vmem>>, vector<32x96xf32>
    %cst_63 = arith.constant dense<0.000000e+00> : vector<1x96xf32>
    %108 = tpu.matmul %106, %107, %cst_63 {dimension_numbers = #tpu.dot_dimension_numbers<[1], [0], [0], [1], [0, 0, 1, 1], [], []>} : vector<1x32xf32>, vector<32x96xf32>, vector<1x96xf32> -> vector<1x96xf32>
    %109 = vector.extract_strided_slice %80 {offsets = [0, 8], sizes = [1, 32], strides = [1, 1]} : vector<1x104xf32> to vector<1x32xf32>
    %110 = vector.extract_strided_slice %80 {offsets = [0, 40], sizes = [1, 32], strides = [1, 1]} : vector<1x104xf32> to vector<1x32xf32>
    %111 = vector.extract_strided_slice %80 {offsets = [0, 72], sizes = [1, 32], strides = [1, 1]} : vector<1x104xf32> to vector<1x32xf32>
    %112 = vector.extract_strided_slice %108 {offsets = [0, 0], sizes = [1, 32], strides = [1, 1]} : vector<1x96xf32> to vector<1x32xf32>
    %113 = arith.addf %112, %109 : vector<1x32xf32>
    %c0_64 = arith.constant 0 : index
    %c0_65 = arith.constant 0 : index
    %114 = vector.load %arg9[%c0_64, %c0_65] : memref<1x32xf32, #tpu.memory_space<vmem>>, vector<1x32xf32>
    %115 = arith.addf %113, %114 : vector<1x32xf32>
    %cst_66 = arith.constant 5.000000e-01 : f32
    %116 = vector.broadcast %cst_66 : f32 to vector<1x32xf32>
    %117 = arith.mulf %116, %115 : vector<1x32xf32>
    %118 = math.tanh %117 : vector<1x32xf32>
    %cst_67 = arith.constant 1.000000e+00 : f32
    %119 = vector.broadcast %cst_67 : f32 to vector<1x32xf32>
    %120 = arith.addf %118, %119 : vector<1x32xf32>
    %cst_68 = arith.constant 5.000000e-01 : f32
    %121 = vector.broadcast %cst_68 : f32 to vector<1x32xf32>
    %122 = arith.mulf %121, %120 : vector<1x32xf32>
    %123 = vector.extract_strided_slice %108 {offsets = [0, 32], sizes = [1, 32], strides = [1, 1]} : vector<1x96xf32> to vector<1x32xf32>
    %124 = arith.addf %123, %110 : vector<1x32xf32>
    %c0_69 = arith.constant 0 : index
    %c0_70 = arith.constant 0 : index
    %125 = vector.load %arg10[%c0_69, %c0_70] : memref<1x32xf32, #tpu.memory_space<vmem>>, vector<1x32xf32>
    %126 = arith.addf %124, %125 : vector<1x32xf32>
    %cst_71 = arith.constant 5.000000e-01 : f32
    %127 = vector.broadcast %cst_71 : f32 to vector<1x32xf32>
    %128 = arith.mulf %127, %126 : vector<1x32xf32>
    %129 = math.tanh %128 : vector<1x32xf32>
    %cst_72 = arith.constant 1.000000e+00 : f32
    %130 = vector.broadcast %cst_72 : f32 to vector<1x32xf32>
    %131 = arith.addf %129, %130 : vector<1x32xf32>
    %cst_73 = arith.constant 5.000000e-01 : f32
    %132 = vector.broadcast %cst_73 : f32 to vector<1x32xf32>
    %133 = arith.mulf %132, %131 : vector<1x32xf32>
    %134 = vector.extract_strided_slice %108 {offsets = [0, 64], sizes = [1, 32], strides = [1, 1]} : vector<1x96xf32> to vector<1x32xf32>
    %c0_74 = arith.constant 0 : index
    %c0_75 = arith.constant 0 : index
    %135 = vector.load %arg11[%c0_74, %c0_75] : memref<1x32xf32, #tpu.memory_space<vmem>>, vector<1x32xf32>
    %136 = arith.addf %134, %135 : vector<1x32xf32>
    %c0_76 = arith.constant 0 : index
    %c0_77 = arith.constant 0 : index
    %137 = vector.load %arg12[%c0_76, %c0_77] : memref<1x32xf32, #tpu.memory_space<vmem>>, vector<1x32xf32>
    %138 = arith.addf %111, %137 : vector<1x32xf32>
    %139 = arith.mulf %122, %138 : vector<1x32xf32>
    %140 = arith.addf %136, %139 : vector<1x32xf32>
    %141 = math.tanh %140 : vector<1x32xf32>
    %cst_78 = arith.constant 1.000000e+00 : f32
    %142 = vector.broadcast %cst_78 : f32 to vector<1x32xf32>
    %143 = arith.subf %142, %133 : vector<1x32xf32>
    %144 = arith.mulf %143, %141 : vector<1x32xf32>
    %145 = arith.mulf %133, %72 : vector<1x32xf32>
    %146 = arith.addf %144, %145 : vector<1x32xf32>
    %147 = arith.index_cast %c1_i32 : i32 to index
    %c0_79 = arith.constant 0 : index
    %148 = vector.load %arg18[%147, %c0_79] : memref<6x32xf32, #tpu.memory_space<vmem>>, vector<1x32xf32>
    tpu.vector_store %arg18[%147, %c0_79], %146 {strides = array<i32>} : memref<6x32xf32, #tpu.memory_space<vmem>>, vector<1x32xf32>,
    %c2_i32 = arith.constant 2 : i32
    %149 = arith.index_cast %c2_i32 : i32 to index
    %c0_80 = arith.constant 0 : index
    %150 = vector.load %arg0[%149, %c0_80] : memref<6x32xf32, #tpu.memory_space<vmem>>, vector<1x32xf32>
    %c0_81 = arith.constant 0 : index
    %c0_82 = arith.constant 0 : index
    %151 = vector.load %arg3[%c0_81, %c0_82] : memref<32x40xf32, #tpu.memory_space<vmem>>, vector<32x40xf32>
    %cst_83 = arith.constant dense<0.000000e+00> : vector<1x40xf32>
    %152 = tpu.matmul %150, %151, %cst_83 {dimension_numbers = #tpu.dot_dimension_numbers<[1], [0], [0], [1], [0, 0, 1, 1], [], []>} : vector<1x32xf32>, vector<32x40xf32>, vector<1x40xf32> -> vector<1x40xf32>
    %c0_84 = arith.constant 0 : index
    %c0_85 = arith.constant 0 : index
    %153 = vector.load %arg4[%c0_84, %c0_85] : memref<32x104xf32, #tpu.memory_space<vmem>>, vector<32x104xf32>
    %cst_86 = arith.constant dense<0.000000e+00> : vector<1x104xf32>
    %154 = tpu.matmul %146, %153, %cst_86 {dimension_numbers = #tpu.dot_dimension_numbers<[1], [0], [0], [1], [0, 0, 1, 1], [], []>} : vector<1x32xf32>, vector<32x104xf32>, vector<1x104xf32> -> vector<1x104xf32>
    %155 = vector.extract_strided_slice %152 {offsets = [0, 0], sizes = [1, 8], strides = [1, 1]} : vector<1x40xf32> to vector<1x8xf32>
    %156 = vector.extract_strided_slice %154 {offsets = [0, 0], sizes = [1, 8], strides = [1, 1]} : vector<1x104xf32> to vector<1x8xf32>
    %157 = arith.addf %155, %156 : vector<1x8xf32>
    %c0_87 = arith.constant 0 : index
    %c0_88 = arith.constant 0 : index
    %158 = vector.load %arg7[%c0_87, %c0_88] : memref<1x8xf32, #tpu.memory_space<vmem>>, vector<1x8xf32>
    %159 = arith.addf %157, %158 : vector<1x8xf32>
    %cst_89 = arith.constant dense<0xFF800000> : vector<1xf32>
    %160 = vector.multi_reduction <maximumf>, %159, %cst_89 [1] : vector<1x8xf32> to vector<1xf32>
    %161 = vector.shape_cast %160 : vector<1xf32> to vector<1x1xf32>
    %162 = vector.broadcast %161 : vector<1x1xf32> to vector<1x8xf32>
    %163 = arith.subf %159, %162 : vector<1x8xf32>
    %164 = math.exp %163 : vector<1x8xf32>
    %cst_90 = arith.constant dense<0.000000e+00> : vector<1xf32>
    %165 = vector.multi_reduction <add>, %164, %cst_90 [1] : vector<1x8xf32> to vector<1xf32>
    %166 = vector.shape_cast %165 : vector<1xf32> to vector<1x1xf32>
    %167 = vector.broadcast %166 : vector<1x1xf32> to vector<1x8xf32>
    %168 = arith.divf %164, %167 : vector<1x8xf32>
    %169 = arith.index_cast %c2_i32 : i32 to index
    %c0_91 = arith.constant 0 : index
    %170 = vector.load %arg17[%169, %c0_91] : memref<6x8xf32, #tpu.memory_space<vmem>>, vector<1x8xf32>
    tpu.vector_store %arg17[%169, %c0_91], %168 {strides = array<i32>} : memref<6x8xf32, #tpu.memory_space<vmem>>, vector<1x8xf32>,
    %c0_92 = arith.constant 0 : index
    %c0_93 = arith.constant 0 : index
    %171 = vector.load %arg2[%c0_92, %c0_93] : memref<8x32xf32, #tpu.memory_space<vmem>>, vector<8x32xf32>
    %cst_94 = arith.constant dense<0.000000e+00> : vector<1x32xf32>
    %172 = tpu.matmul %168, %171, %cst_94 {dimension_numbers = #tpu.dot_dimension_numbers<[1], [0], [0], [1], [0, 0, 1, 1], [], []>} : vector<1x8xf32>, vector<8x32xf32>, vector<1x32xf32> -> vector<1x32xf32>
    %173 = vector.extract_strided_slice %152 {offsets = [0, 8], sizes = [1, 32], strides = [1, 1]} : vector<1x40xf32> to vector<1x32xf32>
    %c0_95 = arith.constant 0 : index
    %c0_96 = arith.constant 0 : index
    %174 = vector.load %arg8[%c0_95, %c0_96] : memref<1x32xf32, #tpu.memory_space<vmem>>, vector<1x32xf32>
    %175 = arith.addf %173, %174 : vector<1x32xf32>
    %c0_97 = arith.constant 0 : index
    %c0_98 = arith.constant 0 : index
    %176 = vector.load %arg6[%c0_97, %c0_98] : memref<32x32xf32, #tpu.memory_space<vmem>>, vector<32x32xf32>
    %cst_99 = arith.constant dense<0.000000e+00> : vector<1x32xf32>
    %177 = tpu.matmul %172, %176, %cst_99 {dimension_numbers = #tpu.dot_dimension_numbers<[1], [0], [0], [1], [0, 0, 1, 1], [], []>} : vector<1x32xf32>, vector<32x32xf32>, vector<1x32xf32> -> vector<1x32xf32>
    %178 = arith.addf %175, %177 : vector<1x32xf32>
    %cst_100 = arith.constant 0.000000e+00 : f32
    %179 = vector.broadcast %cst_100 : f32 to vector<1x32xf32>
    %180 = arith.maximumf %178, %179 : vector<1x32xf32>
    %c0_101 = arith.constant 0 : index
    %c0_102 = arith.constant 0 : index
    %181 = vector.load %arg5[%c0_101, %c0_102] : memref<32x96xf32, #tpu.memory_space<vmem>>, vector<32x96xf32>
    %cst_103 = arith.constant dense<0.000000e+00> : vector<1x96xf32>
    %182 = tpu.matmul %180, %181, %cst_103 {dimension_numbers = #tpu.dot_dimension_numbers<[1], [0], [0], [1], [0, 0, 1, 1], [], []>} : vector<1x32xf32>, vector<32x96xf32>, vector<1x96xf32> -> vector<1x96xf32>
    %183 = vector.extract_strided_slice %154 {offsets = [0, 8], sizes = [1, 32], strides = [1, 1]} : vector<1x104xf32> to vector<1x32xf32>
    %184 = vector.extract_strided_slice %154 {offsets = [0, 40], sizes = [1, 32], strides = [1, 1]} : vector<1x104xf32> to vector<1x32xf32>
    %185 = vector.extract_strided_slice %154 {offsets = [0, 72], sizes = [1, 32], strides = [1, 1]} : vector<1x104xf32> to vector<1x32xf32>
    %186 = vector.extract_strided_slice %182 {offsets = [0, 0], sizes = [1, 32], strides = [1, 1]} : vector<1x96xf32> to vector<1x32xf32>
    %187 = arith.addf %186, %183 : vector<1x32xf32>
    %c0_104 = arith.constant 0 : index
    %c0_105 = arith.constant 0 : index
    %188 = vector.load %arg9[%c0_104, %c0_105] : memref<1x32xf32, #tpu.memory_space<vmem>>, vector<1x32xf32>
    %189 = arith.addf %187, %188 : vector<1x32xf32>
    %cst_106 = arith.constant 5.000000e-01 : f32
    %190 = vector.broadcast %cst_106 : f32 to vector<1x32xf32>
    %191 = arith.mulf %190, %189 : vector<1x32xf32>
    %192 = math.tanh %191 : vector<1x32xf32>
    %cst_107 = arith.constant 1.000000e+00 : f32
    %193 = vector.broadcast %cst_107 : f32 to vector<1x32xf32>
    %194 = arith.addf %192, %193 : vector<1x32xf32>
    %cst_108 = arith.constant 5.000000e-01 : f32
    %195 = vector.broadcast %cst_108 : f32 to vector<1x32xf32>
    %196 = arith.mulf %195, %194 : vector<1x32xf32>
    %197 = vector.extract_strided_slice %182 {offsets = [0, 32], sizes = [1, 32], strides = [1, 1]} : vector<1x96xf32> to vector<1x32xf32>
    %198 = arith.addf %197, %184 : vector<1x32xf32>
    %c0_109 = arith.constant 0 : index
    %c0_110 = arith.constant 0 : index
    %199 = vector.load %arg10[%c0_109, %c0_110] : memref<1x32xf32, #tpu.memory_space<vmem>>, vector<1x32xf32>
    %200 = arith.addf %198, %199 : vector<1x32xf32>
    %cst_111 = arith.constant 5.000000e-01 : f32
    %201 = vector.broadcast %cst_111 : f32 to vector<1x32xf32>
    %202 = arith.mulf %201, %200 : vector<1x32xf32>
    %203 = math.tanh %202 : vector<1x32xf32>
    %cst_112 = arith.constant 1.000000e+00 : f32
    %204 = vector.broadcast %cst_112 : f32 to vector<1x32xf32>
    %205 = arith.addf %203, %204 : vector<1x32xf32>
    %cst_113 = arith.constant 5.000000e-01 : f32
    %206 = vector.broadcast %cst_113 : f32 to vector<1x32xf32>
    %207 = arith.mulf %206, %205 : vector<1x32xf32>
    %208 = vector.extract_strided_slice %182 {offsets = [0, 64], sizes = [1, 32], strides = [1, 1]} : vector<1x96xf32> to vector<1x32xf32>
    %c0_114 = arith.constant 0 : index
    %c0_115 = arith.constant 0 : index
    %209 = vector.load %arg11[%c0_114, %c0_115] : memref<1x32xf32, #tpu.memory_space<vmem>>, vector<1x32xf32>
    %210 = arith.addf %208, %209 : vector<1x32xf32>
    %c0_116 = arith.constant 0 : index
    %c0_117 = arith.constant 0 : index
    %211 = vector.load %arg12[%c0_116, %c0_117] : memref<1x32xf32, #tpu.memory_space<vmem>>, vector<1x32xf32>
    %212 = arith.addf %185, %211 : vector<1x32xf32>
    %213 = arith.mulf %196, %212 : vector<1x32xf32>
    %214 = arith.addf %210, %213 : vector<1x32xf32>
    %215 = math.tanh %214 : vector<1x32xf32>
    %cst_118 = arith.constant 1.000000e+00 : f32
    %216 = vector.broadcast %cst_118 : f32 to vector<1x32xf32>
    %217 = arith.subf %216, %207 : vector<1x32xf32>
    %218 = arith.mulf %217, %215 : vector<1x32xf32>
    %219 = arith.mulf %207, %146 : vector<1x32xf32>
    %220 = arith.addf %218, %219 : vector<1x32xf32>
    %221 = arith.index_cast %c2_i32 : i32 to index
    %c0_119 = arith.constant 0 : index
    %222 = vector.load %arg18[%221, %c0_119] : memref<6x32xf32, #tpu.memory_space<vmem>>, vector<1x32xf32>
    tpu.vector_store %arg18[%221, %c0_119], %220 {strides = array<i32>} : memref<6x32xf32, #tpu.memory_space<vmem>>, vector<1x32xf32>,
    %c3_i32 = arith.constant 3 : i32
    %223 = arith.index_cast %c3_i32 : i32 to index
    %c0_120 = arith.constant 0 : index
    %224 = vector.load %arg0[%223, %c0_120] : memref<6x32xf32, #tpu.memory_space<vmem>>, vector<1x32xf32>
    %c0_121 = arith.constant 0 : index
    %c0_122 = arith.constant 0 : index
    %225 = vector.load %arg3[%c0_121, %c0_122] : memref<32x40xf32, #tpu.memory_space<vmem>>, vector<32x40xf32>
    %cst_123 = arith.constant dense<0.000000e+00> : vector<1x40xf32>
    %226 = tpu.matmul %224, %225, %cst_123 {dimension_numbers = #tpu.dot_dimension_numbers<[1], [0], [0], [1], [0, 0, 1, 1], [], []>} : vector<1x32xf32>, vector<32x40xf32>, vector<1x40xf32> -> vector<1x40xf32>
    %c0_124 = arith.constant 0 : index
    %c0_125 = arith.constant 0 : index
    %227 = vector.load %arg4[%c0_124, %c0_125] : memref<32x104xf32, #tpu.memory_space<vmem>>, vector<32x104xf32>
    %cst_126 = arith.constant dense<0.000000e+00> : vector<1x104xf32>
    %228 = tpu.matmul %220, %227, %cst_126 {dimension_numbers = #tpu.dot_dimension_numbers<[1], [0], [0], [1], [0, 0, 1, 1], [], []>} : vector<1x32xf32>, vector<32x104xf32>, vector<1x104xf32> -> vector<1x104xf32>
    %229 = vector.extract_strided_slice %226 {offsets = [0, 0], sizes = [1, 8], strides = [1, 1]} : vector<1x40xf32> to vector<1x8xf32>
    %230 = vector.extract_strided_slice %228 {offsets = [0, 0], sizes = [1, 8], strides = [1, 1]} : vector<1x104xf32> to vector<1x8xf32>
    %231 = arith.addf %229, %230 : vector<1x8xf32>
    %c0_127 = arith.constant 0 : index
    %c0_128 = arith.constant 0 : index
    %232 = vector.load %arg7[%c0_127, %c0_128] : memref<1x8xf32, #tpu.memory_space<vmem>>, vector<1x8xf32>
    %233 = arith.addf %231, %232 : vector<1x8xf32>
    %cst_129 = arith.constant dense<0xFF800000> : vector<1xf32>
    %234 = vector.multi_reduction <maximumf>, %233, %cst_129 [1] : vector<1x8xf32> to vector<1xf32>
    %235 = vector.shape_cast %234 : vector<1xf32> to vector<1x1xf32>
    %236 = vector.broadcast %235 : vector<1x1xf32> to vector<1x8xf32>
    %237 = arith.subf %233, %236 : vector<1x8xf32>
    %238 = math.exp %237 : vector<1x8xf32>
    %cst_130 = arith.constant dense<0.000000e+00> : vector<1xf32>
    %239 = vector.multi_reduction <add>, %238, %cst_130 [1] : vector<1x8xf32> to vector<1xf32>
    %240 = vector.shape_cast %239 : vector<1xf32> to vector<1x1xf32>
    %241 = vector.broadcast %240 : vector<1x1xf32> to vector<1x8xf32>
    %242 = arith.divf %238, %241 : vector<1x8xf32>
    %243 = arith.index_cast %c3_i32 : i32 to index
    %c0_131 = arith.constant 0 : index
    %244 = vector.load %arg17[%243, %c0_131] : memref<6x8xf32, #tpu.memory_space<vmem>>, vector<1x8xf32>
    tpu.vector_store %arg17[%243, %c0_131], %242 {strides = array<i32>} : memref<6x8xf32, #tpu.memory_space<vmem>>, vector<1x8xf32>,
    %c0_132 = arith.constant 0 : index
    %c0_133 = arith.constant 0 : index
    %245 = vector.load %arg2[%c0_132, %c0_133] : memref<8x32xf32, #tpu.memory_space<vmem>>, vector<8x32xf32>
    %cst_134 = arith.constant dense<0.000000e+00> : vector<1x32xf32>
    %246 = tpu.matmul %242, %245, %cst_134 {dimension_numbers = #tpu.dot_dimension_numbers<[1], [0], [0], [1], [0, 0, 1, 1], [], []>} : vector<1x8xf32>, vector<8x32xf32>, vector<1x32xf32> -> vector<1x32xf32>
    %247 = vector.extract_strided_slice %226 {offsets = [0, 8], sizes = [1, 32], strides = [1, 1]} : vector<1x40xf32> to vector<1x32xf32>
    %c0_135 = arith.constant 0 : index
    %c0_136 = arith.constant 0 : index
    %248 = vector.load %arg8[%c0_135, %c0_136] : memref<1x32xf32, #tpu.memory_space<vmem>>, vector<1x32xf32>
    %249 = arith.addf %247, %248 : vector<1x32xf32>
    %c0_137 = arith.constant 0 : index
    %c0_138 = arith.constant 0 : index
    %250 = vector.load %arg6[%c0_137, %c0_138] : memref<32x32xf32, #tpu.memory_space<vmem>>, vector<32x32xf32>
    %cst_139 = arith.constant dense<0.000000e+00> : vector<1x32xf32>
    %251 = tpu.matmul %246, %250, %cst_139 {dimension_numbers = #tpu.dot_dimension_numbers<[1], [0], [0], [1], [0, 0, 1, 1], [], []>} : vector<1x32xf32>, vector<32x32xf32>, vector<1x32xf32> -> vector<1x32xf32>
    %252 = arith.addf %249, %251 : vector<1x32xf32>
    %cst_140 = arith.constant 0.000000e+00 : f32
    %253 = vector.broadcast %cst_140 : f32 to vector<1x32xf32>
    %254 = arith.maximumf %252, %253 : vector<1x32xf32>
    %c0_141 = arith.constant 0 : index
    %c0_142 = arith.constant 0 : index
    %255 = vector.load %arg5[%c0_141, %c0_142] : memref<32x96xf32, #tpu.memory_space<vmem>>, vector<32x96xf32>
    %cst_143 = arith.constant dense<0.000000e+00> : vector<1x96xf32>
    %256 = tpu.matmul %254, %255, %cst_143 {dimension_numbers = #tpu.dot_dimension_numbers<[1], [0], [0], [1], [0, 0, 1, 1], [], []>} : vector<1x32xf32>, vector<32x96xf32>, vector<1x96xf32> -> vector<1x96xf32>
    %257 = vector.extract_strided_slice %228 {offsets = [0, 8], sizes = [1, 32], strides = [1, 1]} : vector<1x104xf32> to vector<1x32xf32>
    %258 = vector.extract_strided_slice %228 {offsets = [0, 40], sizes = [1, 32], strides = [1, 1]} : vector<1x104xf32> to vector<1x32xf32>
    %259 = vector.extract_strided_slice %228 {offsets = [0, 72], sizes = [1, 32], strides = [1, 1]} : vector<1x104xf32> to vector<1x32xf32>
    %260 = vector.extract_strided_slice %256 {offsets = [0, 0], sizes = [1, 32], strides = [1, 1]} : vector<1x96xf32> to vector<1x32xf32>
    %261 = arith.addf %260, %257 : vector<1x32xf32>
    %c0_144 = arith.constant 0 : index
    %c0_145 = arith.constant 0 : index
    %262 = vector.load %arg9[%c0_144, %c0_145] : memref<1x32xf32, #tpu.memory_space<vmem>>, vector<1x32xf32>
    %263 = arith.addf %261, %262 : vector<1x32xf32>
    %cst_146 = arith.constant 5.000000e-01 : f32
    %264 = vector.broadcast %cst_146 : f32 to vector<1x32xf32>
    %265 = arith.mulf %264, %263 : vector<1x32xf32>
    %266 = math.tanh %265 : vector<1x32xf32>
    %cst_147 = arith.constant 1.000000e+00 : f32
    %267 = vector.broadcast %cst_147 : f32 to vector<1x32xf32>
    %268 = arith.addf %266, %267 : vector<1x32xf32>
    %cst_148 = arith.constant 5.000000e-01 : f32
    %269 = vector.broadcast %cst_148 : f32 to vector<1x32xf32>
    %270 = arith.mulf %269, %268 : vector<1x32xf32>
    %271 = vector.extract_strided_slice %256 {offsets = [0, 32], sizes = [1, 32], strides = [1, 1]} : vector<1x96xf32> to vector<1x32xf32>
    %272 = arith.addf %271, %258 : vector<1x32xf32>
    %c0_149 = arith.constant 0 : index
    %c0_150 = arith.constant 0 : index
    %273 = vector.load %arg10[%c0_149, %c0_150] : memref<1x32xf32, #tpu.memory_space<vmem>>, vector<1x32xf32>
    %274 = arith.addf %272, %273 : vector<1x32xf32>
    %cst_151 = arith.constant 5.000000e-01 : f32
    %275 = vector.broadcast %cst_151 : f32 to vector<1x32xf32>
    %276 = arith.mulf %275, %274 : vector<1x32xf32>
    %277 = math.tanh %276 : vector<1x32xf32>
    %cst_152 = arith.constant 1.000000e+00 : f32
    %278 = vector.broadcast %cst_152 : f32 to vector<1x32xf32>
    %279 = arith.addf %277, %278 : vector<1x32xf32>
    %cst_153 = arith.constant 5.000000e-01 : f32
    %280 = vector.broadcast %cst_153 : f32 to vector<1x32xf32>
    %281 = arith.mulf %280, %279 : vector<1x32xf32>
    %282 = vector.extract_strided_slice %256 {offsets = [0, 64], sizes = [1, 32], strides = [1, 1]} : vector<1x96xf32> to vector<1x32xf32>
    %c0_154 = arith.constant 0 : index
    %c0_155 = arith.constant 0 : index
    %283 = vector.load %arg11[%c0_154, %c0_155] : memref<1x32xf32, #tpu.memory_space<vmem>>, vector<1x32xf32>
    %284 = arith.addf %282, %283 : vector<1x32xf32>
    %c0_156 = arith.constant 0 : index
    %c0_157 = arith.constant 0 : index
    %285 = vector.load %arg12[%c0_156, %c0_157] : memref<1x32xf32, #tpu.memory_space<vmem>>, vector<1x32xf32>
    %286 = arith.addf %259, %285 : vector<1x32xf32>
    %287 = arith.mulf %270, %286 : vector<1x32xf32>
    %288 = arith.addf %284, %287 : vector<1x32xf32>
    %289 = math.tanh %288 : vector<1x32xf32>
    %cst_158 = arith.constant 1.000000e+00 : f32
    %290 = vector.broadcast %cst_158 : f32 to vector<1x32xf32>
    %291 = arith.subf %290, %281 : vector<1x32xf32>
    %292 = arith.mulf %291, %289 : vector<1x32xf32>
    %293 = arith.mulf %281, %220 : vector<1x32xf32>
    %294 = arith.addf %292, %293 : vector<1x32xf32>
    %295 = arith.index_cast %c3_i32 : i32 to index
    %c0_159 = arith.constant 0 : index
    %296 = vector.load %arg18[%295, %c0_159] : memref<6x32xf32, #tpu.memory_space<vmem>>, vector<1x32xf32>
    tpu.vector_store %arg18[%295, %c0_159], %294 {strides = array<i32>} : memref<6x32xf32, #tpu.memory_space<vmem>>, vector<1x32xf32>,
    %c4_i32 = arith.constant 4 : i32
    %297 = arith.index_cast %c4_i32 : i32 to index
    %c0_160 = arith.constant 0 : index
    %298 = vector.load %arg0[%297, %c0_160] : memref<6x32xf32, #tpu.memory_space<vmem>>, vector<1x32xf32>
    %c0_161 = arith.constant 0 : index
    %c0_162 = arith.constant 0 : index
    %299 = vector.load %arg3[%c0_161, %c0_162] : memref<32x40xf32, #tpu.memory_space<vmem>>, vector<32x40xf32>
    %cst_163 = arith.constant dense<0.000000e+00> : vector<1x40xf32>
    %300 = tpu.matmul %298, %299, %cst_163 {dimension_numbers = #tpu.dot_dimension_numbers<[1], [0], [0], [1], [0, 0, 1, 1], [], []>} : vector<1x32xf32>, vector<32x40xf32>, vector<1x40xf32> -> vector<1x40xf32>
    %c0_164 = arith.constant 0 : index
    %c0_165 = arith.constant 0 : index
    %301 = vector.load %arg4[%c0_164, %c0_165] : memref<32x104xf32, #tpu.memory_space<vmem>>, vector<32x104xf32>
    %cst_166 = arith.constant dense<0.000000e+00> : vector<1x104xf32>
    %302 = tpu.matmul %294, %301, %cst_166 {dimension_numbers = #tpu.dot_dimension_numbers<[1], [0], [0], [1], [0, 0, 1, 1], [], []>} : vector<1x32xf32>, vector<32x104xf32>, vector<1x104xf32> -> vector<1x104xf32>
    %303 = vector.extract_strided_slice %300 {offsets = [0, 0], sizes = [1, 8], strides = [1, 1]} : vector<1x40xf32> to vector<1x8xf32>
    %304 = vector.extract_strided_slice %302 {offsets = [0, 0], sizes = [1, 8], strides = [1, 1]} : vector<1x104xf32> to vector<1x8xf32>
    %305 = arith.addf %303, %304 : vector<1x8xf32>
    %c0_167 = arith.constant 0 : index
    %c0_168 = arith.constant 0 : index
    %306 = vector.load %arg7[%c0_167, %c0_168] : memref<1x8xf32, #tpu.memory_space<vmem>>, vector<1x8xf32>
    %307 = arith.addf %305, %306 : vector<1x8xf32>
    %cst_169 = arith.constant dense<0xFF800000> : vector<1xf32>
    %308 = vector.multi_reduction <maximumf>, %307, %cst_169 [1] : vector<1x8xf32> to vector<1xf32>
    %309 = vector.shape_cast %308 : vector<1xf32> to vector<1x1xf32>
    %310 = vector.broadcast %309 : vector<1x1xf32> to vector<1x8xf32>
    %311 = arith.subf %307, %310 : vector<1x8xf32>
    %312 = math.exp %311 : vector<1x8xf32>
    %cst_170 = arith.constant dense<0.000000e+00> : vector<1xf32>
    %313 = vector.multi_reduction <add>, %312, %cst_170 [1] : vector<1x8xf32> to vector<1xf32>
    %314 = vector.shape_cast %313 : vector<1xf32> to vector<1x1xf32>
    %315 = vector.broadcast %314 : vector<1x1xf32> to vector<1x8xf32>
    %316 = arith.divf %312, %315 : vector<1x8xf32>
    %317 = arith.index_cast %c4_i32 : i32 to index
    %c0_171 = arith.constant 0 : index
    %318 = vector.load %arg17[%317, %c0_171] : memref<6x8xf32, #tpu.memory_space<vmem>>, vector<1x8xf32>
    tpu.vector_store %arg17[%317, %c0_171], %316 {strides = array<i32>} : memref<6x8xf32, #tpu.memory_space<vmem>>, vector<1x8xf32>,
    %c0_172 = arith.constant 0 : index
    %c0_173 = arith.constant 0 : index
    %319 = vector.load %arg2[%c0_172, %c0_173] : memref<8x32xf32, #tpu.memory_space<vmem>>, vector<8x32xf32>
    %cst_174 = arith.constant dense<0.000000e+00> : vector<1x32xf32>
    %320 = tpu.matmul %316, %319, %cst_174 {dimension_numbers = #tpu.dot_dimension_numbers<[1], [0], [0], [1], [0, 0, 1, 1], [], []>} : vector<1x8xf32>, vector<8x32xf32>, vector<1x32xf32> -> vector<1x32xf32>
    %321 = vector.extract_strided_slice %300 {offsets = [0, 8], sizes = [1, 32], strides = [1, 1]} : vector<1x40xf32> to vector<1x32xf32>
    %c0_175 = arith.constant 0 : index
    %c0_176 = arith.constant 0 : index
    %322 = vector.load %arg8[%c0_175, %c0_176] : memref<1x32xf32, #tpu.memory_space<vmem>>, vector<1x32xf32>
    %323 = arith.addf %321, %322 : vector<1x32xf32>
    %c0_177 = arith.constant 0 : index
    %c0_178 = arith.constant 0 : index
    %324 = vector.load %arg6[%c0_177, %c0_178] : memref<32x32xf32, #tpu.memory_space<vmem>>, vector<32x32xf32>
    %cst_179 = arith.constant dense<0.000000e+00> : vector<1x32xf32>
    %325 = tpu.matmul %320, %324, %cst_179 {dimension_numbers = #tpu.dot_dimension_numbers<[1], [0], [0], [1], [0, 0, 1, 1], [], []>} : vector<1x32xf32>, vector<32x32xf32>, vector<1x32xf32> -> vector<1x32xf32>
    %326 = arith.addf %323, %325 : vector<1x32xf32>
    %cst_180 = arith.constant 0.000000e+00 : f32
    %327 = vector.broadcast %cst_180 : f32 to vector<1x32xf32>
    %328 = arith.maximumf %326, %327 : vector<1x32xf32>
    %c0_181 = arith.constant 0 : index
    %c0_182 = arith.constant 0 : index
    %329 = vector.load %arg5[%c0_181, %c0_182] : memref<32x96xf32, #tpu.memory_space<vmem>>, vector<32x96xf32>
    %cst_183 = arith.constant dense<0.000000e+00> : vector<1x96xf32>
    %330 = tpu.matmul %328, %329, %cst_183 {dimension_numbers = #tpu.dot_dimension_numbers<[1], [0], [0], [1], [0, 0, 1, 1], [], []>} : vector<1x32xf32>, vector<32x96xf32>, vector<1x96xf32> -> vector<1x96xf32>
    %331 = vector.extract_strided_slice %302 {offsets = [0, 8], sizes = [1, 32], strides = [1, 1]} : vector<1x104xf32> to vector<1x32xf32>
    %332 = vector.extract_strided_slice %302 {offsets = [0, 40], sizes = [1, 32], strides = [1, 1]} : vector<1x104xf32> to vector<1x32xf32>
    %333 = vector.extract_strided_slice %302 {offsets = [0, 72], sizes = [1, 32], strides = [1, 1]} : vector<1x104xf32> to vector<1x32xf32>
    %334 = vector.extract_strided_slice %330 {offsets = [0, 0], sizes = [1, 32], strides = [1, 1]} : vector<1x96xf32> to vector<1x32xf32>
    %335 = arith.addf %334, %331 : vector<1x32xf32>
    %c0_184 = arith.constant 0 : index
    %c0_185 = arith.constant 0 : index
    %336 = vector.load %arg9[%c0_184, %c0_185] : memref<1x32xf32, #tpu.memory_space<vmem>>, vector<1x32xf32>
    %337 = arith.addf %335, %336 : vector<1x32xf32>
    %cst_186 = arith.constant 5.000000e-01 : f32
    %338 = vector.broadcast %cst_186 : f32 to vector<1x32xf32>
    %339 = arith.mulf %338, %337 : vector<1x32xf32>
    %340 = math.tanh %339 : vector<1x32xf32>
    %cst_187 = arith.constant 1.000000e+00 : f32
    %341 = vector.broadcast %cst_187 : f32 to vector<1x32xf32>
    %342 = arith.addf %340, %341 : vector<1x32xf32>
    %cst_188 = arith.constant 5.000000e-01 : f32
    %343 = vector.broadcast %cst_188 : f32 to vector<1x32xf32>
    %344 = arith.mulf %343, %342 : vector<1x32xf32>
    %345 = vector.extract_strided_slice %330 {offsets = [0, 32], sizes = [1, 32], strides = [1, 1]} : vector<1x96xf32> to vector<1x32xf32>
    %346 = arith.addf %345, %332 : vector<1x32xf32>
    %c0_189 = arith.constant 0 : index
    %c0_190 = arith.constant 0 : index
    %347 = vector.load %arg10[%c0_189, %c0_190] : memref<1x32xf32, #tpu.memory_space<vmem>>, vector<1x32xf32>
    %348 = arith.addf %346, %347 : vector<1x32xf32>
    %cst_191 = arith.constant 5.000000e-01 : f32
    %349 = vector.broadcast %cst_191 : f32 to vector<1x32xf32>
    %350 = arith.mulf %349, %348 : vector<1x32xf32>
    %351 = math.tanh %350 : vector<1x32xf32>
    %cst_192 = arith.constant 1.000000e+00 : f32
    %352 = vector.broadcast %cst_192 : f32 to vector<1x32xf32>
    %353 = arith.addf %351, %352 : vector<1x32xf32>
    %cst_193 = arith.constant 5.000000e-01 : f32
    %354 = vector.broadcast %cst_193 : f32 to vector<1x32xf32>
    %355 = arith.mulf %354, %353 : vector<1x32xf32>
    %356 = vector.extract_strided_slice %330 {offsets = [0, 64], sizes = [1, 32], strides = [1, 1]} : vector<1x96xf32> to vector<1x32xf32>
    %c0_194 = arith.constant 0 : index
    %c0_195 = arith.constant 0 : index
    %357 = vector.load %arg11[%c0_194, %c0_195] : memref<1x32xf32, #tpu.memory_space<vmem>>, vector<1x32xf32>
    %358 = arith.addf %356, %357 : vector<1x32xf32>
    %c0_196 = arith.constant 0 : index
    %c0_197 = arith.constant 0 : index
    %359 = vector.load %arg12[%c0_196, %c0_197] : memref<1x32xf32, #tpu.memory_space<vmem>>, vector<1x32xf32>
    %360 = arith.addf %333, %359 : vector<1x32xf32>
    %361 = arith.mulf %344, %360 : vector<1x32xf32>
    %362 = arith.addf %358, %361 : vector<1x32xf32>
    %363 = math.tanh %362 : vector<1x32xf32>
    %cst_198 = arith.constant 1.000000e+00 : f32
    %364 = vector.broadcast %cst_198 : f32 to vector<1x32xf32>
    %365 = arith.subf %364, %355 : vector<1x32xf32>
    %366 = arith.mulf %365, %363 : vector<1x32xf32>
    %367 = arith.mulf %355, %294 : vector<1x32xf32>
    %368 = arith.addf %366, %367 : vector<1x32xf32>
    %369 = arith.index_cast %c4_i32 : i32 to index
    %c0_199 = arith.constant 0 : index
    %370 = vector.load %arg18[%369, %c0_199] : memref<6x32xf32, #tpu.memory_space<vmem>>, vector<1x32xf32>
    tpu.vector_store %arg18[%369, %c0_199], %368 {strides = array<i32>} : memref<6x32xf32, #tpu.memory_space<vmem>>, vector<1x32xf32>,
    %c5_i32 = arith.constant 5 : i32
    %371 = arith.index_cast %c5_i32 : i32 to index
    %c0_200 = arith.constant 0 : index
    %372 = vector.load %arg0[%371, %c0_200] : memref<6x32xf32, #tpu.memory_space<vmem>>, vector<1x32xf32>
    %c0_201 = arith.constant 0 : index
    %c0_202 = arith.constant 0 : index
    %373 = vector.load %arg3[%c0_201, %c0_202] : memref<32x40xf32, #tpu.memory_space<vmem>>, vector<32x40xf32>
    %cst_203 = arith.constant dense<0.000000e+00> : vector<1x40xf32>
    %374 = tpu.matmul %372, %373, %cst_203 {dimension_numbers = #tpu.dot_dimension_numbers<[1], [0], [0], [1], [0, 0, 1, 1], [], []>} : vector<1x32xf32>, vector<32x40xf32>, vector<1x40xf32> -> vector<1x40xf32>
    %c0_204 = arith.constant 0 : index
    %c0_205 = arith.constant 0 : index
    %375 = vector.load %arg4[%c0_204, %c0_205] : memref<32x104xf32, #tpu.memory_space<vmem>>, vector<32x104xf32>
    %cst_206 = arith.constant dense<0.000000e+00> : vector<1x104xf32>
    %376 = tpu.matmul %368, %375, %cst_206 {dimension_numbers = #tpu.dot_dimension_numbers<[1], [0], [0], [1], [0, 0, 1, 1], [], []>} : vector<1x32xf32>, vector<32x104xf32>, vector<1x104xf32> -> vector<1x104xf32>
    %377 = vector.extract_strided_slice %374 {offsets = [0, 0], sizes = [1, 8], strides = [1, 1]} : vector<1x40xf32> to vector<1x8xf32>
    %378 = vector.extract_strided_slice %376 {offsets = [0, 0], sizes = [1, 8], strides = [1, 1]} : vector<1x104xf32> to vector<1x8xf32>
    %379 = arith.addf %377, %378 : vector<1x8xf32>
    %c0_207 = arith.constant 0 : index
    %c0_208 = arith.constant 0 : index
    %380 = vector.load %arg7[%c0_207, %c0_208] : memref<1x8xf32, #tpu.memory_space<vmem>>, vector<1x8xf32>
    %381 = arith.addf %379, %380 : vector<1x8xf32>
    %cst_209 = arith.constant dense<0xFF800000> : vector<1xf32>
    %382 = vector.multi_reduction <maximumf>, %381, %cst_209 [1] : vector<1x8xf32> to vector<1xf32>
    %383 = vector.shape_cast %382 : vector<1xf32> to vector<1x1xf32>
    %384 = vector.broadcast %383 : vector<1x1xf32> to vector<1x8xf32>
    %385 = arith.subf %381, %384 : vector<1x8xf32>
    %386 = math.exp %385 : vector<1x8xf32>
    %cst_210 = arith.constant dense<0.000000e+00> : vector<1xf32>
    %387 = vector.multi_reduction <add>, %386, %cst_210 [1] : vector<1x8xf32> to vector<1xf32>
    %388 = vector.shape_cast %387 : vector<1xf32> to vector<1x1xf32>
    %389 = vector.broadcast %388 : vector<1x1xf32> to vector<1x8xf32>
    %390 = arith.divf %386, %389 : vector<1x8xf32>
    %391 = arith.index_cast %c5_i32 : i32 to index
    %c0_211 = arith.constant 0 : index
    %392 = vector.load %arg17[%391, %c0_211] : memref<6x8xf32, #tpu.memory_space<vmem>>, vector<1x8xf32>
    tpu.vector_store %arg17[%391, %c0_211], %390 {strides = array<i32>} : memref<6x8xf32, #tpu.memory_space<vmem>>, vector<1x8xf32>,
    %c0_212 = arith.constant 0 : index
    %c0_213 = arith.constant 0 : index
    %393 = vector.load %arg2[%c0_212, %c0_213] : memref<8x32xf32, #tpu.memory_space<vmem>>, vector<8x32xf32>
    %cst_214 = arith.constant dense<0.000000e+00> : vector<1x32xf32>
    %394 = tpu.matmul %390, %393, %cst_214 {dimension_numbers = #tpu.dot_dimension_numbers<[1], [0], [0], [1], [0, 0, 1, 1], [], []>} : vector<1x8xf32>, vector<8x32xf32>, vector<1x32xf32> -> vector<1x32xf32>
    %395 = vector.extract_strided_slice %374 {offsets = [0, 8], sizes = [1, 32], strides = [1, 1]} : vector<1x40xf32> to vector<1x32xf32>
    %c0_215 = arith.constant 0 : index
    %c0_216 = arith.constant 0 : index
    %396 = vector.load %arg8[%c0_215, %c0_216] : memref<1x32xf32, #tpu.memory_space<vmem>>, vector<1x32xf32>
    %397 = arith.addf %395, %396 : vector<1x32xf32>
    %c0_217 = arith.constant 0 : index
    %c0_218 = arith.constant 0 : index
    %398 = vector.load %arg6[%c0_217, %c0_218] : memref<32x32xf32, #tpu.memory_space<vmem>>, vector<32x32xf32>
    %cst_219 = arith.constant dense<0.000000e+00> : vector<1x32xf32>
    %399 = tpu.matmul %394, %398, %cst_219 {dimension_numbers = #tpu.dot_dimension_numbers<[1], [0], [0], [1], [0, 0, 1, 1], [], []>} : vector<1x32xf32>, vector<32x32xf32>, vector<1x32xf32> -> vector<1x32xf32>
    %400 = arith.addf %397, %399 : vector<1x32xf32>
    %cst_220 = arith.constant 0.000000e+00 : f32
    %401 = vector.broadcast %cst_220 : f32 to vector<1x32xf32>
    %402 = arith.maximumf %400, %401 : vector<1x32xf32>
    %c0_221 = arith.constant 0 : index
    %c0_222 = arith.constant 0 : index
    %403 = vector.load %arg5[%c0_221, %c0_222] : memref<32x96xf32, #tpu.memory_space<vmem>>, vector<32x96xf32>
    %cst_223 = arith.constant dense<0.000000e+00> : vector<1x96xf32>
    %404 = tpu.matmul %402, %403, %cst_223 {dimension_numbers = #tpu.dot_dimension_numbers<[1], [0], [0], [1], [0, 0, 1, 1], [], []>} : vector<1x32xf32>, vector<32x96xf32>, vector<1x96xf32> -> vector<1x96xf32>
    %405 = vector.extract_strided_slice %376 {offsets = [0, 8], sizes = [1, 32], strides = [1, 1]} : vector<1x104xf32> to vector<1x32xf32>
    %406 = vector.extract_strided_slice %376 {offsets = [0, 40], sizes = [1, 32], strides = [1, 1]} : vector<1x104xf32> to vector<1x32xf32>
    %407 = vector.extract_strided_slice %376 {offsets = [0, 72], sizes = [1, 32], strides = [1, 1]} : vector<1x104xf32> to vector<1x32xf32>
    %408 = vector.extract_strided_slice %404 {offsets = [0, 0], sizes = [1, 32], strides = [1, 1]} : vector<1x96xf32> to vector<1x32xf32>
    %409 = arith.addf %408, %405 : vector<1x32xf32>
    %c0_224 = arith.constant 0 : index
    %c0_225 = arith.constant 0 : index
    %410 = vector.load %arg9[%c0_224, %c0_225] : memref<1x32xf32, #tpu.memory_space<vmem>>, vector<1x32xf32>
    %411 = arith.addf %409, %410 : vector<1x32xf32>
    %cst_226 = arith.constant 5.000000e-01 : f32
    %412 = vector.broadcast %cst_226 : f32 to vector<1x32xf32>
    %413 = arith.mulf %412, %411 : vector<1x32xf32>
    %414 = math.tanh %413 : vector<1x32xf32>
    %cst_227 = arith.constant 1.000000e+00 : f32
    %415 = vector.broadcast %cst_227 : f32 to vector<1x32xf32>
    %416 = arith.addf %414, %415 : vector<1x32xf32>
    %cst_228 = arith.constant 5.000000e-01 : f32
    %417 = vector.broadcast %cst_228 : f32 to vector<1x32xf32>
    %418 = arith.mulf %417, %416 : vector<1x32xf32>
    %419 = vector.extract_strided_slice %404 {offsets = [0, 32], sizes = [1, 32], strides = [1, 1]} : vector<1x96xf32> to vector<1x32xf32>
    %420 = arith.addf %419, %406 : vector<1x32xf32>
    %c0_229 = arith.constant 0 : index
    %c0_230 = arith.constant 0 : index
    %421 = vector.load %arg10[%c0_229, %c0_230] : memref<1x32xf32, #tpu.memory_space<vmem>>, vector<1x32xf32>
    %422 = arith.addf %420, %421 : vector<1x32xf32>
    %cst_231 = arith.constant 5.000000e-01 : f32
    %423 = vector.broadcast %cst_231 : f32 to vector<1x32xf32>
    %424 = arith.mulf %423, %422 : vector<1x32xf32>
    %425 = math.tanh %424 : vector<1x32xf32>
    %cst_232 = arith.constant 1.000000e+00 : f32
    %426 = vector.broadcast %cst_232 : f32 to vector<1x32xf32>
    %427 = arith.addf %425, %426 : vector<1x32xf32>
    %cst_233 = arith.constant 5.000000e-01 : f32
    %428 = vector.broadcast %cst_233 : f32 to vector<1x32xf32>
    %429 = arith.mulf %428, %427 : vector<1x32xf32>
    %430 = vector.extract_strided_slice %404 {offsets = [0, 64], sizes = [1, 32], strides = [1, 1]} : vector<1x96xf32> to vector<1x32xf32>
    %c0_234 = arith.constant 0 : index
    %c0_235 = arith.constant 0 : index
    %431 = vector.load %arg11[%c0_234, %c0_235] : memref<1x32xf32, #tpu.memory_space<vmem>>, vector<1x32xf32>
    %432 = arith.addf %430, %431 : vector<1x32xf32>
    %c0_236 = arith.constant 0 : index
    %c0_237 = arith.constant 0 : index
    %433 = vector.load %arg12[%c0_236, %c0_237] : memref<1x32xf32, #tpu.memory_space<vmem>>, vector<1x32xf32>
    %434 = arith.addf %407, %433 : vector<1x32xf32>
    %435 = arith.mulf %418, %434 : vector<1x32xf32>
    %436 = arith.addf %432, %435 : vector<1x32xf32>
    %437 = math.tanh %436 : vector<1x32xf32>
    %cst_238 = arith.constant 1.000000e+00 : f32
    %438 = vector.broadcast %cst_238 : f32 to vector<1x32xf32>
    %439 = arith.subf %438, %429 : vector<1x32xf32>
    %440 = arith.mulf %439, %437 : vector<1x32xf32>
    %441 = arith.mulf %429, %368 : vector<1x32xf32>
    %442 = arith.addf %440, %441 : vector<1x32xf32>
    %443 = arith.index_cast %c5_i32 : i32 to index
    %c0_239 = arith.constant 0 : index
    %444 = vector.load %arg18[%443, %c0_239] : memref<6x32xf32, #tpu.memory_space<vmem>>, vector<1x32xf32>
    tpu.vector_store %arg18[%443, %c0_239], %442 {strides = array<i32>} : memref<6x32xf32, #tpu.memory_space<vmem>>, vector<1x32xf32>,
    %c6_i32 = arith.constant 6 : i32
    %c0_240 = arith.constant 0 : index
    %c0_241 = arith.constant 0 : index
    %445 = vector.load %arg16[%c0_240, %c0_241] : memref<1x32xf32, #tpu.memory_space<vmem>>, vector<1x32xf32>
    tpu.vector_store %arg16[%c0_240, %c0_241], %442 {strides = array<i32>} : memref<1x32xf32, #tpu.memory_space<vmem>>, vector<1x32xf32>,
    %c0_242 = arith.constant 0 : index
    %c0_243 = arith.constant 0 : index
    %446 = vector.load %arg18[%c0_242, %c0_243] : memref<6x32xf32, #tpu.memory_space<vmem>>, vector<6x32xf32>
    %c0_244 = arith.constant 0 : index
    %c0_245 = arith.constant 0 : index
    %447 = vector.load %arg13[%c0_244, %c0_245] : memref<32x48xf32, #tpu.memory_space<vmem>>, vector<32x48xf32>
    %cst_246 = arith.constant dense<0.000000e+00> : vector<6x48xf32>
    %448 = tpu.matmul %446, %447, %cst_246 {dimension_numbers = #tpu.dot_dimension_numbers<[1], [0], [0], [1], [0, 0, 1, 1], [], []>} : vector<6x32xf32>, vector<32x48xf32>, vector<6x48xf32> -> vector<6x48xf32>
    %c0_247 = arith.constant 0 : index
    %c0_248 = arith.constant 0 : index
    %449 = vector.load %arg14[%c0_247, %c0_248] : memref<1x48xf32, #tpu.memory_space<vmem>>, vector<1x48xf32>
    %450 = vector.broadcast %449 : vector<1x48xf32> to vector<6x48xf32>
    %451 = arith.addf %448, %450 : vector<6x48xf32>
    %cst_249 = arith.constant dense<0xFF800000> : vector<6xf32>
    %452 = vector.multi_reduction <maximumf>, %451, %cst_249 [1] : vector<6x48xf32> to vector<6xf32>
    %453 = vector.shape_cast %452 : vector<6xf32> to vector<6x1xf32>
    %454 = vector.broadcast %453 : vector<6x1xf32> to vector<6x48xf32>
    %455 = arith.subf %451, %454 : vector<6x48xf32>
    %456 = math.exp %455 : vector<6x48xf32>
    %cst_250 = arith.constant dense<0.000000e+00> : vector<6xf32>
    %457 = vector.multi_reduction <add>, %456, %cst_250 [1] : vector<6x48xf32> to vector<6xf32>
    %458 = vector.shape_cast %457 : vector<6xf32> to vector<6x1xf32>
    %459 = math.log %458 : vector<6x1xf32>
    %460 = vector.broadcast %459 : vector<6x1xf32> to vector<6x48xf32>
    %461 = arith.subf %455, %460 : vector<6x48xf32>
    %c0_251 = arith.constant 0 : index
    %c0_252 = arith.constant 0 : index
    %462 = vector.load %arg15[%c0_251, %c0_252] : memref<6x48xf32, #tpu.memory_space<vmem>>, vector<6x48xf32>
    tpu.vector_store %arg15[%c0_251, %c0_252], %461 {strides = array<i32>} : memref<6x48xf32, #tpu.memory_space<vmem>>, vector<6x48xf32>,
    return
  }
}

</mosaic_0001>

<bundles_post_ra>
// kernel: tpu_custom_call.1
= control target key start
LH: loop header
LB: loop body
LE: loop exit
PB: predicated region body
PF: predicated region fallthrough
CT: control target
= control target key end

     0   :  { %s4861_s0 = inlined_call_operand.hbm [shape: f32[6,32], index: 0, kind: input, shape index: {}]   ;;  %s4862_s1 = inlined_call_operand.vmem [shape: f32[1,32], index: 1, kind: input, shape index: {}]   ;;  %s4863_s2 = inlined_call_operand.hbm [shape: f32[8,32], index: 2, kind: input, shape index: {}]   ;;  %s4864_s3 = inlined_call_operand.hbm [shape: f32[32,40], index: 3, kind: input, shape index: {}]   ;;  %s4865_s4 = inlined_call_operand.hbm [shape: f32[32,104], index: 4, kind: input, shape index: {}]   ;;  %s4866_s5 = inlined_call_operand.hbm [shape: f32[32,96], index: 5, kind: input, shape index: {}]   ;;  %s4867_s6 = inlined_call_operand.hbm [shape: f32[32,32], index: 6, kind: input, shape index: {}]   ;;  %s4868_s7 = inlined_call_operand.vmem [shape: f32[1,8], index: 7, kind: input, shape index: {}]   ;;  %s4869_s8 = inlined_call_operand.vmem [shape: f32[1,32], index: 8, kind: input, shape index: {}]   ;;  %s4870_s9 = inlined_call_operand.vmem [shape: f32[1,32], index: 9, kind: input, shape index: {}]   ;;  %s4871_s10 = inlined_call_operand.vmem [shape: f32[1,32], index: 10, kind: input, shape index: {}]   ;;  %s4872_s11 = inlined_call_operand.vmem [shape: f32[1,32], index: 11, kind: input, shape index: {}]   ;;  %s4873_s12 = inlined_call_operand.vmem [shape: f32[1,32], index: 12, kind: input, shape index: {}]   ;;  %s4874_s13 = inlined_call_operand.vmem [shape: f32[32,48], index: 13, kind: input, shape index: {}]   ;;  %s4875_s14 = inlined_call_operand.vmem [shape: f32[1,48], index: 14, kind: input, shape index: {}]   ;;  %s4876_s15 = inlined_call_operand.hbm [shape: f32[6,48], index: 15, kind: output, shape index: {0}]   ;;  %s4877_s16 = inlined_call_operand.hbm [shape: f32[1,32], index: 16, kind: output, shape index: {1}]   ;;  %s4878_s17 = inlined_call_operand.hbm [shape: f32[6,8], index: 17, kind: output, shape index: {2}]  }
   0x1   :  { %4880 = sst [smem:[#allocation24_spill]] %s4861_s0 }
   0x2   :  { %4881 = sst [smem:[#allocation25_spill]] %s4862_s1 }
   0x3   :  { %23 = vsyncpa [#allocation4], 0 }
   0x4   :  { %24 = vsyncpa [#allocation7], 0 }
   0x5   :  { %25 = vsyncpa [#allocation10], 0 }
   0x6   :  { %26 = vsyncpa [#allocation13], 0 }
   0x7   :  { %27 = vsyncpa [#allocation5], 0 }
   0x8   :  { %28 = vsyncpa [#allocation16], 0  ;;  %s4137_s24 = smov [#allocation6]   ;;  %s3927_s28 = scalar_lea.hbm %s4863_s2, 128 }
   0x9   :  { %s47_s25 = sshll.u32 %s4137_s24, 4  ;;  %p3928_p0 = scmp.ne.s32.totalorder %s4863_s2, %s3927_s28  ;;  %s48_s25 = int_to_ptr.vmem [resolvable:$true] %s47_s25 }
   0xa   :  { %p3931_p1 = scmp.lt.u32.totalorder %s3927_s28, %s4863_s2 }
   0xc   :  { %p3933_p2 = pnand %p3931_p1, %p3928_p0 }
   0xe   :  { %3936 = shalt.err (!%p3933_p2)
}
   0xf   :  { %s3937_s19 = scalar_lea.vmem %s48_s25, 128  ;;  %p3942_p4 = scmp.lt.s32.totalorder %s48_s25, %s48_s25 }
  0x10   :  { %p3938_p3 = scmp.ne.s32.totalorder %s48_s25, %s3937_s19  ;;  %p3943_p5 = scmp.lt.s32.totalorder %s3937_s19, %s3937_s19 }
  0x12   :  { %p3944_p6 = por %p3943_p5, %p3942_p4 }
  0x14   :  { %p3945_p7 = pnand %p3944_p6, %p3938_p3 }
  0x16   :  { %3948 = shalt.err (!%p3945_p7)
}
  0x17   :  { %50 = dma.hbm_to_vmem [thread:$0]  %s4863_s2, 128, %s48_s25, [#allocation7]  }
  0x18   :  { %s4138_s21 = smov [#allocation9]   ;;  %s4139_s23 = smov [#allocation3]  }
  0x19   :  { %s68_s22 = sshll.u32 %s4138_s21, 4  ;;  %s35_s24 = sshll.u32 %s4139_s23, 4  ;;  %s69_s22 = int_to_ptr.vmem [resolvable:$true] %s68_s22  ;;  %s36_s24 = int_to_ptr.vmem [resolvable:$true] %s35_s24 }
  0x1a   :  { %s3949_s28 = scalar_lea.hbm %s4865_s4, 512 }
  0x1b   :  { %p3950_p8 = scmp.ne.s32.totalorder %s4865_s4, %s3949_s28  ;;  %p3953_p9 = scmp.lt.u32.totalorder %s3949_s28, %s4865_s4 }
  0x1d   :  { %p3955_p10 = pnand %p3953_p9, %p3950_p8 }
  0x1f   :  { %3958 = shalt.err (!%p3955_p10)
}
  0x20   :  { %s3959_s2 = scalar_lea.vmem %s69_s22, 512  ;;  %p3964_p12 = scmp.lt.s32.totalorder %s69_s22, %s69_s22 }
  0x21   :  { %p3960_p11 = scmp.ne.s32.totalorder %s69_s22, %s3959_s2  ;;  %p3965_p13 = scmp.lt.s32.totalorder %s3959_s2, %s3959_s2 }
  0x23   :  { %p3966_p0 = por %p3965_p13, %p3964_p12 }
  0x25   :  { %p3967_p1 = pnand %p3966_p0, %p3960_p11 }
  0x27   :  { %3970 = shalt.err (!%p3967_p1)
}
  0x28   :  { %s4140_s25 = smov 128   ;;  %s4141_s19 = smov 8  }
  0x29   :  { %74 = dma.hbm_to_vmem [thread:$0]  %s4865_s4, 512, %s69_s22, [#allocation10], %s4140_s25, %s4140_s25, %s4141_s19  }
  0x2a   :  { %s4882_s26 = sld [smem:[#allocation24_spill]] }
  0x30   :  { %s3971_s27 = scalar_lea.hbm %s4882_s26, 128 }
  0x31   :  { %p3972_p2 = scmp.ne.s32.totalorder %s4882_s26, %s3971_s27  ;;  %p3975_p3 = scmp.lt.u32.totalorder %s3971_s27, %s4882_s26 }
  0x33   :  { %p3977_p4 = pnand %p3975_p3, %p3972_p2 }
  0x35   :  { %3980 = shalt.err (!%p3977_p4)
}
  0x36   :  { %s3981_s18 = scalar_lea.vmem %s36_s24, 128  ;;  %p3986_p6 = scmp.lt.s32.totalorder %s36_s24, %s36_s24 }
  0x37   :  { %p3982_p5 = scmp.ne.s32.totalorder %s36_s24, %s3981_s18  ;;  %p3987_p7 = scmp.lt.s32.totalorder %s3981_s18, %s3981_s18 }
  0x39   :  { %p3988_p8 = por %p3987_p7, %p3986_p6 }
  0x3b   :  { %p3989_p9 = pnand %p3988_p8, %p3982_p5 }
  0x3d   :  { %3992 = shalt.err (!%p3989_p9)
}
  0x3e   :  { %38 = dma.hbm_to_vmem [thread:$0]  %s4882_s26, 128, %s36_s24, [#allocation4]  }
  0x3f   :  { %s4142_s2 = smov [#allocation8]   ;;  %s4143_s20 = smov [#allocation11]  }
  0x40   :  { %s56_s1 = sshll.u32 %s4142_s2, 4  ;;  %s80_s21 = sshll.u32 %s4143_s20, 4  ;;  %s57_s1 = int_to_ptr.vmem [resolvable:$true] %s56_s1  ;;  %s81_s21 = int_to_ptr.vmem [resolvable:$true] %s80_s21 }
  0x41   :  { %s3993_s28 = scalar_lea.hbm %s4864_s3, 512 }
  0x42   :  { %p3994_p10 = scmp.ne.s32.totalorder %s4864_s3, %s3993_s28  ;;  %p3997_p11 = scmp.lt.u32.totalorder %s3993_s28, %s4864_s3 }
  0x44   :  { %p3999_p12 = pnand %p3997_p11, %p3994_p10 }
  0x46   :  { %4002 = shalt.err (!%p3999_p12)
}
  0x47   :  { %s4003_s24 = scalar_lea.vmem %s57_s1, 512  ;;  %p4008_p0 = scmp.lt.s32.totalorder %s57_s1, %s57_s1 }
  0x48   :  { %p4004_p13 = scmp.ne.s32.totalorder %s57_s1, %s4003_s24  ;;  %p4009_p1 = scmp.lt.s32.totalorder %s4003_s24, %s4003_s24 }
  0x4a   :  { %p4010_p2 = por %p4009_p1, %p4008_p0 }
  0x4c   :  { %p4011_p3 = pnand %p4010_p2, %p4004_p13 }
  0x4e   :  { %4014 = shalt.err (!%p4011_p3)
}
  0x4f   :  { %62 = dma.hbm_to_vmem [thread:$0]  %s4864_s3, 512, %s57_s1, [#allocation7], %s4140_s25, %s4140_s25, %s4141_s19  }
  0x50   :  { %s4015_s20 = scalar_lea.hbm %s4866_s5, 512 }
  0x51   :  { %p4016_p4 = scmp.ne.s32.totalorder %s4866_s5, %s4015_s20  ;;  %p4019_p5 = scmp.lt.u32.totalorder %s4015_s20, %s4866_s5 }
  0x53   :  { %p4021_p6 = pnand %p4019_p5, %p4016_p4 }
  0x55   :  { %4024 = shalt.err (!%p4021_p6)
}
  0x56   :  { %s4025_s0 = scalar_lea.vmem %s81_s21, 512  ;;  %p4030_p8 = scmp.lt.s32.totalorder %s81_s21, %s81_s21 }
  0x57   :  { %p4026_p7 = scmp.ne.s32.totalorder %s81_s21, %s4025_s0  ;;  %p4031_p9 = scmp.lt.s32.totalorder %s4025_s0, %s4025_s0 }
  0x59   :  { %p4032_p10 = por %p4031_p9, %p4030_p8 }
  0x5b   :  { %p4033_p11 = pnand %p4032_p10, %p4026_p7 }
  0x5d   :  { %4036 = shalt.err (!%p4033_p11)
}
  0x5e   :  { %86 = dma.hbm_to_vmem [thread:$0]  %s4866_s5, 512, %s81_s21, [#allocation10], %s4140_s25, %s4140_s25, %s4141_s19  }
  0x5f   :  { %s4144_s30 = smov [#allocation12]   ;;  %s4037_s4 = scalar_lea.hbm %s4867_s6, 512 }
  0x60   :  { %s92_s18 = sshll.u32 %s4144_s30, 4  ;;  %p4038_p12 = scmp.ne.s32.totalorder %s4867_s6, %s4037_s4  ;;  %s93_s18 = int_to_ptr.vmem [resolvable:$true] %s92_s18 }
  0x61   :  { %p4041_p13 = scmp.lt.u32.totalorder %s4037_s4, %s4867_s6 }
  0x63   :  { %p4043_p0 = pnand %p4041_p13, %p4038_p12 }
  0x65   :  { %4046 = shalt.err (!%p4043_p0)
}
  0x66   :  { %s4047_s27 = scalar_lea.vmem %s93_s18, 512  ;;  %p4052_p2 = scmp.lt.s32.totalorder %s93_s18, %s93_s18 }
  0x67   :  { %p4048_p1 = scmp.ne.s32.totalorder %s93_s18, %s4047_s27  ;;  %p4053_p3 = scmp.lt.s32.totalorder %s4047_s27, %s4047_s27 }
  0x69   :  { %p4054_p4 = por %p4053_p3, %p4052_p2 }
  0x6b   :  { %p4055_p5 = pnand %p4054_p4, %p4048_p1 }
  0x6d   :  { %4058 = shalt.err (!%p4055_p5)
}
  0x6e   :  { %98 = dma.hbm_to_vmem [thread:$0]  %s4867_s6, 512, %s93_s18, [#allocation13], %s4140_s25, %s4140_s25, %s4141_s19  }
  0x6f   :  { %4125 = dma.done.wait [#allocation4], 128  }
  0x70   :  { %4126 = vsyncadd [#allocation4], 4294967168 }
  0x71   :  { %4127 = dma.done.wait [#allocation7], 640  }
  0x72   :  { %4128 = vsyncadd [#allocation7], 4294966656 }
  0x73   :  { %4129 = dma.done.wait [#allocation10], 1024  }
  0x74   :  { %4130 = vsyncadd [#allocation10], 4294966272 }
  0x75   :  { %4131 = dma.done.wait [#allocation13], 512  }
  0x76   :  { %4132 = vsyncadd [#allocation13], 4294966784  ;;  %v4145_v0 = vmov 0.0|0.0   ;;  %vm4146_vm0 = vmmov 0   ;;  %v4147_v1 = vmov 0.0   ;;  %v135_v2 = vld [vmem:[#allocation8] sm:$0xff] }
  0x77   :  { %3693 = vmatprep.subr.bf16.mxu0 %v4145_v0  ;;  %3699 = vmatprep.subr.bf16.mxu1 %v4145_v0  ;;  %v136_v3 = vld [vmem:[#allocation8 + $0x8] sm:$0xff]  ;;  %v213_v4 = vld [vmem:[#allocation9] sm:$0xff]  ;;  %v137_v7 = vld [vmem:[#allocation8 + $0x10] sm:$0xff]  ;;  %vm139_vm1 = vcmask 261120   ;;  %s4883_s0 = sld [smem:[#allocation25_spill]]  ;;  %vm293_vm2 = vcmask 57344  }
  0x78   :  { %3396 = vmatprep.mubr.msk.f32.mxu0 %vm4146_vm0, %v4147_v1  ;;  %3407 = vmatprep.mubr.msk.f32.mxu1 %vm4146_vm0, %v4147_v1  ;;  %v4337_v5 = vpack.c.bf16 %v136_v3, %v135_v2  ;;  %v214_v6 = vld [vmem:[#allocation9 + $0x8] sm:$0xff]  ;;  %v138_v8 = vld [vmem:[#allocation8 + $0x18] sm:$0xff]  ;;  %v215_v10 = vld [vmem:[#allocation9 + $0x10] sm:$0xff]  ;;  %vm307_vm3 = vcmask 64512   ;;  %s4148_s24 = smov 72   ;;  %s4149_s26 = smov 120  }
  0x79   :  { %v4339_v9 = vpack.c.bf16 %v214_v6, %v213_v4  ;;  %v216_v11 = vld [vmem:[#allocation9 + $0x18] sm:$0xff]  ;;  %v4342_v12 = vpack.c.bf16 %v138_v8, %v137_v7  ;;  %v4347_v13 = vld [vmem:[%s4869_s8] ss:$0 sm:$0xff]  ;;  %v134_v15 = vld [vmem:[#allocation3] sm:$0x1]  ;;  %s4150_s4 = smov 56   ;;  %v615_v6 = vlaneseq }
  0x7a   :  { %3695 = vmatpush3.bf16.msra.mxu0 %v4337_v5  ;;  %v4351_v14 = vpack.c.bf16 %v216_v11, %v215_v10  ;;  %387 = vrot.lane.b32.xlu1 %v4347_v13, %s4141_s19  ;;  %v291_v20 = vld [vmem:[%s4868_s7] sm:$0x1]  ;;  %v4383_v30 = vld [vmem:[#allocation6] sm:$0xff]  ;;  %v391_v32 = vld [vmem:[#allocation12] sm:$0xff]  ;;  %s4151_s20 = smov 64   ;;  %s4152_s6 = smov 32  }
  0x7b   :  { %3701 = vmatpush3.bf16.msra.mxu1 %v4339_v9  ;;  %3696 = vmatprep.subr.bf16.mxu0 %v4145_v0  ;;  %v392_v33 = vld [vmem:[#allocation12 + $0x8] sm:$0xff]  ;;  %v393_v37 = vld [vmem:[#allocation12 + $0x10] sm:$0xff]  ;;  %v394_v38 = vld [vmem:[#allocation12 + $0x18] sm:$0xff]  ;;  %v616_v11 = vshrl.u32 %v615_v6, 7  ;;  %s4153_s25 = smov 96   ;;  %vm628_vm4 = vcmask 253952  }
  0x7c   :  { %3702 = vmatprep.subr.bf16.mxu1 %v4145_v0  ;;  %v4387_v35 = vpack.c.bf16 %v392_v33, %v391_v32  ;;  %v4392_v39 = vpack.c.bf16 %v394_v38, %v393_v37  ;;  %v474_v42 = vld [vmem:[#allocation11] sm:$0xff]  ;;  %v475_v43 = vld [vmem:[#allocation11 + $0x8] sm:$0xff]  ;;  %v476_v44 = vld [vmem:[#allocation11 + $0x10] sm:$0xff]  ;;  %vm3136_vm5 = vcmask 390144  }
  0x7d   :  { %v4361_v16 = vld [vmem:[%s4883_s0] sm:$0x1]  ;;  %v4406_v45 = vpack.c.bf16 %v475_v43, %v474_v42  ;;  %v477_v46 = vld [vmem:[#allocation11 + $0x18] sm:$0xff] }
  0x7e   :  { %3698 = vmatpush3.bf16.msra.mxu0 %v4342_v12  ;;  %v4409_v47 = vpack.c.bf16 %v477_v46, %v476_v44  ;;  %v4416_v50 = vld [vmem:[%s4873_s12] ss:$0 sm:$0xff] }
  0x7f   :  { %3704 = vmatpush3.bf16.msra.mxu1 %v4351_v14  ;;  %3711 = vmatprep.subr.bf16.mxu0 %v4145_v0  ;;  %v4431_v58 = vld [vmem:[%s4872_s11] ss:$0 sm:$0xff] }
  0x80   :  { %3410 = vmatprep.subr.mxu1 %v4147_v1  ;;  %v558_v62 = vld [vmem:[%s4870_s9] sm:$0x1] }
  0x81   :  { %3397 = vmatmul.mubr.msk.f32.vlgmr.msra.gmra.mrb[0].mxu0 %vm139_vm1, %v134_v15  ;;  %v785_v46 = vld [vmem:[%s4868_s7] sm:$0x1] }
  0x82   :  { %3408 = vmatmul.mubr.msk.f32.vlgmr.msra.gmra.mrb[0].mxu1 %vm139_vm1, %v4361_v16  ;;  %3434 = vmatprep.mubr.msk.f32.mxu0 %vm4146_vm0, %v4147_v1 }
  0x83   :  { %3412 = vmatprep.mubr.msk.f32.mxu1 %vm4146_vm0, %v4147_v1  ;;  %3411 = vmatpush3.msra.mxu1 %v4383_v30 }
  0x84   :  { %3705 = vmatprep.subr.bf16.mxu1 %v4145_v0  ;;  %3713 = vmatpush3.bf16.msra.mxu0 %v4406_v45 }
  0x85   :  { %3714 = vmatprep.subr.bf16.mxu0 %v4145_v0 }
  0x88   :  { %3716 = vmatpush3.bf16.msra.mxu0 %v4409_v47 }
  0x89   :  { %3723 = vmatprep.subr.bf16.mxu0 %v4145_v0 }
  0xec   :  { %v388_v51 = vpop.permute.xlu1 %387 }
 0x154   :  { %v4372_v17 = vpop.f32.mrb[0].mxu0 }
 0x155   :  { %v4374_v18 = vpop.f32.mrb[0].mxu1  ;;  %v3398_v19 = vpop.f32.mrb[1].mxu0  ;;  %v390_v52 = vadd.f32 %v388_v51, %v4372_v17 }
 0x156   :  { %v290_v21 = vadd.f32 %v4374_v18, %v4372_v17  ;;  %v3409_v22 = vpop.f32.mrb[1].mxu1  ;;  %v4449_v19 = vld [vmem:[%s4871_s10] ss:$0 sm:$0xff] }
 0x158   :  { %v292_v23 = vadd.f32 %v291_v20, %v290_v21 }
 0x15a   :  { %v294_v24 = vsel %vm293_vm2, %v292_v23, -inf }
 0x15b   :  { %295 = vmax.xlane.f32.xlu0 %v294_v24 }
 0x1e8   :  { %v296_v25 = vpop.xlane.xlu0 %295 }
 0x1e9   :  { %v297_v26 = vsub.f32 %v292_v23, %v296_v25  ;;  %v630_v25 = vld [vmem:[#allocation3 + $0x1] sm:$0x1] }
 0x1eb   :  { %v298_v27 = vmul.f32 1.442695, %v297_v26 }
 0x1ed   :  { %3863 = vpow2.f32 %v298_v27 }
 0x1f7   :  { %v3864_v28 = vpop.eup %3863 }
 0x1f8   :  { %v300_v29 = vsel %vm293_vm2, %v3864_v28, 0.0 }
 0x1f9   :  { %301 = vadd.xlane.f32.xlu0 %v300_v29 }
 0x286   :  { %v302_v31 = vpop.xlane.xlu0 %301 }
 0x287   :  { %3865 = vrcp.f32 %v302_v31 }
 0x291   :  { %v3866_v34 = vpop.eup %3865 }
 0x292   :  { %v304_v36 = vmul.f32 %v3866_v34, %v3864_v28 }
 0x294   :  { %305 = vst.msk [vmem:[#allocation17] sm:$0x1] %vm293_vm2, %v304_v36  ;;  %3413 = vmatmul.mubr.msk.f32.vlgmr.msra.gmra.mrb[2].mxu1 %vm307_vm3, %v304_v36 }
 0x295   :  { %3707 = vmatpush3.bf16.msra.mxu1 %v4387_v35  ;;  %3423 = vmatprep.mubr.msk.f32.mxu1 %vm4146_vm0, %v4147_v1 }
 0x296   :  { %3708 = vmatprep.subr.bf16.mxu1 %v4145_v0 }
 0x299   :  { %3710 = vmatpush3.bf16.msra.mxu1 %v4392_v39 }
 0x29a   :  { %3717 = vmatprep.subr.bf16.mxu1 %v4145_v0 }
 0x367   :  { %v377_v40 = vpop.f32.mrb[2].mxu1 }
 0x368   :  { %v3414_v41 = vpop.f32.mrb[3].mxu1  ;;  %3424 = vmatmul.mubr.msk.f32.vlgmr.msra.gmra.mrb[4].mxu1 %vm139_vm1, %v377_v40 }
 0x369   :  { %3719 = vmatpush3.bf16.msra.mxu1 %v4337_v5  ;;  %3445 = vmatprep.mubr.msk.f32.mxu1 %vm4146_vm0, %v4147_v1 }
 0x36a   :  { %3720 = vmatprep.subr.bf16.mxu1 %v4145_v0 }
 0x36d   :  { %3722 = vmatpush3.bf16.msra.mxu1 %v4342_v12 }
 0x36e   :  { %3459 = vmatprep.subr.mxu1 %v4147_v1 }
 0x370   :  { %3446 = vmatmul.mubr.msk.f32.vlgmr.msra.gmra.mrb[6].mxu1 %vm139_vm1, %v630_v25 }
 0x371   :  { %3460 = vmatpush3.msra.mxu1 %v4383_v30  ;;  %3461 = vmatprep.mubr.msk.f32.mxu1 %vm4146_vm0, %v4147_v1 }
 0x372   :  { %3735 = vmatprep.subr.bf16.mxu1 %v4145_v0 }
 0x43b   :  { %v464_v48 = vpop.f32.mrb[4].mxu1 }
 0x43c   :  { %469 = vrot.lane.b32.xlu1 %v464_v48, %s4141_s19  ;;  %v3425_v49 = vpop.f32.mrb[5].mxu1 }
 0x440   :  { %594 = vrot.lane.b32.xlu1 %v4416_v50, %s4148_s24 }
 0x443   :  { %v704_v41 = vpop.f32.mrb[6].mxu1 }
 0x444   :  { %554 = vrot.lane.b32.xlu1 %v4374_v18, %s4149_s26  ;;  %v3447_v42 = vpop.f32.mrb[7].mxu1 }
 0x4ae   :  { %v470_v53 = vpop.permute.xlu1 %469 }
 0x4af   :  { %v472_v54 = vadd.f32 %v470_v53, %v390_v52 }
 0x4b1   :  { %v473_v55 = vmax.f32 %v472_v54, 0.0 }
 0x4b2   :  { %v595_v56 = vpop.permute.xlu1 %594 }
 0x4b3   :  { %v597_v57 = vadd.f32 %v595_v56, %v4374_v18  ;;  %479 = vrot.lane.b32.xlu0 %v473_v55, %s4149_s26  ;;  %v617_v18 = vsub.s32 0, %v616_v11 }
 0x4b5   :  { %599 = vrot.lane.b32.xlu1 %v597_v57, %s4150_s4  ;;  %v618_v20 = vrot.slane %v4361_v16, %v617_v18 }
 0x4b6   :  { %v555_v60 = vpop.permute.xlu1 %554 }
 0x4b9   :  { %584 = vrot.lane.b32.xlu1 %v4431_v58, %s4151_s20 }
 0x525   :  { %v480_v59 = vpop.permute.xlu0 %479 }
 0x526   :  { %3435 = vmatmul.mubr.msk.f32.vlgmr.msra.gmra.mrb[2].mxu0 %vm139_vm1, %v480_v59 }
 0x527   :  { %3725 = vmatpush3.bf16.msra.mxu0 %v4339_v9  ;;  %3456 = vmatprep.mubr.msk.f32.mxu0 %vm4146_vm0, %v4147_v1  ;;  %v600_v15 = vpop.permute.xlu1 %599 }
 0x528   :  { %3726 = vmatprep.subr.bf16.mxu0 %v4145_v0 }
 0x52b   :  { %3728 = vmatpush3.bf16.msra.mxu0 %v4351_v14  ;;  %v585_v21 = vpop.permute.xlu1 %584 }
 0x52c   :  { %3729 = vmatprep.subr.bf16.mxu0 %v4145_v0 }
 0x5f9   :  { %v549_v61 = vpop.f32.mrb[2].mxu0 }
 0x5fa   :  { %v557_v63 = vadd.f32 %v555_v60, %v549_v61  ;;  %v3436_v2 = vpop.f32.mrb[3].mxu0  ;;  %v587_v22 = vadd.f32 %v585_v21, %v549_v61  ;;  %v1050_v21 = vld [vmem:[%s4870_s9] sm:$0x1] }
 0x5fc   :  { %v559_v3 = vadd.f32 %v558_v62, %v557_v63 }
 0x5fe   :  { %v560_v4 = vmul.f32 0.5, %v559_v3 }
 0x600   :  { %3867 = vtanh.f32 %v560_v4 }
 0x60a   :  { %v3868_v7 = vpop.eup %3867 }
 0x60b   :  { %v562_v8 = vadd.f32 1.0, %v3868_v7 }
 0x60d   :  { %v563_v10 = vmul.f32 0.5, %v562_v8 }
 0x60f   :  { %v602_v17 = vmul.f32 %v600_v15, %v563_v10 }
 0x611   :  { %604 = vrot.lane.b32.xlu1 %v602_v17, %s4151_s20 }
 0x615   :  { %570 = vrot.lane.b32.xlu1 %v4449_v19, %s4152_s6 }
 0x619   :  { %619 = vrot.lane.b32.xlu1 %v618_v20, %s4152_s6 }
 0x683   :  { %v605_v23 = vpop.permute.xlu1 %604 }
 0x684   :  { %v607_v24 = vadd.f32 %v605_v23, %v587_v22 }
 0x686   :  { %3869 = vtanh.f32 %v607_v24 }
 0x687   :  { %v571_v16 = vpop.permute.xlu1 %570 }
 0x688   :  { %v573_v27 = vadd.f32 %v571_v16, %v557_v63 }
 0x68a   :  { %v574_v28 = vmul.f32 0.5, %v573_v27 }
 0x68b   :  { %v620_v33 = vpop.permute.xlu1 %619 }
 0x68c   :  { %3871 = vtanh.f32 %v574_v28 }
 0x690   :  { %v3870_v26 = vpop.eup %3869 }
 0x691   :  { %611 = vrot.lane.b32.xlu0 %v3870_v26, %s4153_s25 }
 0x696   :  { %v3872_v29 = vpop.eup %3871 }
 0x697   :  { %v576_v31 = vadd.f32 1.0, %v3872_v29 }
 0x699   :  { %v577_v32 = vmul.f32 0.5, %v576_v31 }
 0x69b   :  { %v609_v34 = vsub.f32 1.0, %v577_v32  ;;  %v622_v37 = vmul.f32 %v620_v33, %v577_v32 }
 0x703   :  { %v612_v36 = vpop.permute.xlu0 %611 }
 0x704   :  { %v614_v38 = vmul.f32 %v612_v36, %v609_v34  ;;  %v1114_v36 = vld [vmem:[#allocation3 + $0x2] sm:$0x1] }
 0x706   :  { %v4461_v40 = vadd.f32 %v622_v37, %v614_v38 }
 0x708   :  { %625 = vrot.lane.b32.xlu0 %v4461_v40, %s4153_s25 }
 0x77a   :  { %v626_v43 = vpop.permute.xlu0 %625 }
 0x77b   :  { %629 = vst.msk [vmem:[#allocation2] sm:$0x1] %vm628_vm4, %v626_v43  ;;  %3457 = vmatmul.mubr.msk.f32.vlgmr.msra.gmra.mrb[4].mxu0 %vm139_vm1, %v626_v43 }
 0x77c   :  { %3731 = vmatpush3.bf16.msra.mxu0 %v4387_v35  ;;  %3472 = vmatprep.mubr.msk.f32.mxu0 %vm4146_vm0, %v4147_v1 }
 0x77d   :  { %3732 = vmatprep.subr.bf16.mxu0 %v4145_v0 }
 0x780   :  { %3734 = vmatpush3.bf16.msra.mxu0 %v4392_v39 }
 0x781   :  { %3741 = vmatprep.subr.bf16.mxu0 %v4145_v0 }
 0x84e   :  { %v780_v44 = vpop.f32.mrb[4].mxu0 }
 0x84f   :  { %v784_v48 = vadd.f32 %v780_v44, %v704_v41  ;;  %v3458_v49 = vpop.f32.mrb[5].mxu0 }
 0x851   :  { %v786_v51 = vadd.f32 %v785_v46, %v784_v48 }
 0x853   :  { %v787_v52 = vsel %vm293_vm2, %v786_v51, -inf }
 0x854   :  { %788 = vmax.xlane.f32.xlu1 %v787_v52 }
 0x8e1   :  { %v789_v53 = vpop.xlane.xlu1 %788 }
 0x8e2   :  { %v790_v54 = vsub.f32 %v786_v51, %v789_v53 }
 0x8e4   :  { %v791_v55 = vmul.f32 1.442695, %v790_v54 }
 0x8e6   :  { %3873 = vpow2.f32 %v791_v55 }
 0x8f0   :  { %v3874_v56 = vpop.eup %3873 }
 0x8f1   :  { %v793_v57 = vsel %vm293_vm2, %v3874_v56, 0.0 }
 0x8f2   :  { %794 = vadd.xlane.f32.xlu0 %v793_v57  ;;  %v1269_v57 = vld [vmem:[%s4868_s7] sm:$0x1] }
 0x908   :  { %879 = vrot.lane.b32.xlu0 %v4347_v13, %s4141_s19 }
 0x90c   :  { %1086 = vrot.lane.b32.xlu0 %v4416_v50, %s4148_s24 }
 0x97f   :  { %v795_v59 = vpop.xlane.xlu0 %794 }
 0x980   :  { %3875 = vrcp.f32 %v795_v59 }
 0x983   :  { %v880_v60 = vpop.permute.xlu0 %879 }
 0x984   :  { %v882_v61 = vadd.f32 %v880_v60, %v704_v41 }
 0x987   :  { %v1087_v62 = vpop.permute.xlu0 %1086 }
 0x988   :  { %v1089_v63 = vadd.f32 %v1087_v62, %v780_v44 }
 0x98a   :  { %v3876_v2 = vpop.eup %3875  ;;  %1091 = vrot.lane.b32.xlu0 %v1089_v63, %s4150_s4 }
 0x98b   :  { %v797_v3 = vmul.f32 %v3876_v2, %v3874_v56 }
 0x98d   :  { %798 = vst.msk [vmem:[#allocation17 + $0x1] sm:$0x1] %vm293_vm2, %v797_v3  ;;  %3462 = vmatmul.mubr.msk.f32.vlgmr.msra.gmra.mrb[8].mxu1 %vm307_vm3, %v797_v3 }
 0x98e   :  { %3737 = vmatpush3.bf16.msra.mxu1 %v4406_v45  ;;  %3483 = vmatprep.mubr.msk.f32.mxu1 %vm4146_vm0, %v4147_v1 }
 0x98f   :  { %3738 = vmatprep.subr.bf16.mxu1 %v4145_v0 }
 0x992   :  { %3740 = vmatpush3.bf16.msra.mxu1 %v4409_v47 }
 0x993   :  { %3747 = vmatprep.subr.bf16.mxu1 %v4145_v0 }
 0x9fc   :  { %v1092_v28 = vpop.permute.xlu0 %1091 }
 0xa60   :  { %v869_v4 = vpop.f32.mrb[8].mxu1 }
 0xa61   :  { %v3463_v6 = vpop.f32.mrb[9].mxu1  ;;  %3473 = vmatmul.mubr.msk.f32.vlgmr.msra.gmra.mrb[6].mxu0 %vm139_vm1, %v869_v4 }
 0xa62   :  { %3743 = vmatpush3.bf16.msra.mxu0 %v4337_v5  ;;  %3494 = vmatprep.mubr.msk.f32.mxu0 %vm4146_vm0, %v4147_v1 }
 0xa63   :  { %3744 = vmatprep.subr.bf16.mxu0 %v4145_v0 }
 0xa66   :  { %3746 = vmatpush3.bf16.msra.mxu0 %v4342_v12 }
 0xa67   :  { %3508 = vmatprep.subr.mxu0 %v4147_v1 }
 0xa69   :  { %3495 = vmatmul.mubr.msk.f32.vlgmr.msra.gmra.mrb[8].mxu0 %vm139_vm1, %v1114_v36 }
 0xa6a   :  { %3509 = vmatpush3.msra.mxu0 %v4383_v30  ;;  %3510 = vmatprep.mubr.msk.f32.mxu0 %vm4146_vm0, %v4147_v1 }
 0xa6b   :  { %3759 = vmatprep.subr.bf16.mxu0 %v4145_v0 }
 0xb34   :  { %v956_v7 = vpop.f32.mrb[6].mxu0 }
 0xb35   :  { %961 = vrot.lane.b32.xlu1 %v956_v7, %s4141_s19  ;;  %v3474_v8 = vpop.f32.mrb[7].mxu0 }
 0xb3c   :  { %v1188_v54 = vpop.f32.mrb[8].mxu0 }
 0xb3d   :  { %v3496_v55 = vpop.f32.mrb[9].mxu0 }
 0xba7   :  { %v962_v10 = vpop.permute.xlu1 %961 }
 0xba8   :  { %v964_v11 = vadd.f32 %v962_v10, %v882_v61 }
 0xbaa   :  { %v965_v15 = vmax.f32 %v964_v11, 0.0 }
 0xbac   :  { %971 = vrot.lane.b32.xlu1 %v965_v15, %s4149_s26 }
 0xbb0   :  { %1046 = vrot.lane.b32.xlu1 %v780_v44, %s4149_s26 }
 0xbb4   :  { %1076 = vrot.lane.b32.xlu1 %v4431_v58, %s4151_s20 }
 0xbb8   :  { %1062 = vrot.lane.b32.xlu1 %v4449_v19, %s4152_s6 }
 0xc1e   :  { %v972_v17 = vpop.permute.xlu1 %971 }
 0xc1f   :  { %3484 = vmatmul.mubr.msk.f32.vlgmr.msra.gmra.mrb[10].mxu1 %vm139_vm1, %v972_v17 }
 0xc20   :  { %3749 = vmatpush3.bf16.msra.mxu1 %v4339_v9  ;;  %3505 = vmatprep.mubr.msk.f32.mxu1 %vm4146_vm0, %v4147_v1 }
 0xc21   :  { %3750 = vmatprep.subr.bf16.mxu1 %v4145_v0 }
 0xc22   :  { %v1047_v18 = vpop.permute.xlu1 %1046 }
 0xc24   :  { %3752 = vmatpush3.bf16.msra.mxu1 %v4351_v14 }
 0xc25   :  { %3753 = vmatprep.subr.bf16.mxu1 %v4145_v0 }
 0xc26   :  { %v1077_v31 = vpop.permute.xlu1 %1076 }
 0xc2a   :  { %v1063_v38 = vpop.permute.xlu1 %1062 }
 0xcf2   :  { %v1041_v20 = vpop.f32.mrb[10].mxu1 }
 0xcf3   :  { %v1049_v22 = vadd.f32 %v1047_v18, %v1041_v20  ;;  %v3485_v23 = vpop.f32.mrb[11].mxu1  ;;  %v1079_v32 = vadd.f32 %v1077_v31, %v1041_v20 }
 0xcf5   :  { %v1051_v24 = vadd.f32 %v1050_v21, %v1049_v22  ;;  %v1065_v41 = vadd.f32 %v1063_v38, %v1049_v22 }
 0xcf7   :  { %v1052_v25 = vmul.f32 0.5, %v1051_v24  ;;  %v1066_v42 = vmul.f32 0.5, %v1065_v41 }
 0xcf9   :  { %3877 = vtanh.f32 %v1052_v25 }
 0xd03   :  { %v3878_v26 = vpop.eup %3877 }
 0xd04   :  { %v1054_v16 = vadd.f32 1.0, %v3878_v26 }
 0xd06   :  { %v1055_v27 = vmul.f32 0.5, %v1054_v16 }
 0xd08   :  { %v1094_v29 = vmul.f32 %v1092_v28, %v1055_v27  ;;  %v1534_v27 = vld [vmem:[%s4870_s9] sm:$0x1] }
 0xd0a   :  { %1096 = vrot.lane.b32.xlu0 %v1094_v29, %s4151_s20 }
 0xd7c   :  { %v1097_v33 = vpop.permute.xlu0 %1096 }
 0xd7d   :  { %v1099_v34 = vadd.f32 %v1097_v33, %v1079_v32 }
 0xd7f   :  { %3879 = vtanh.f32 %v1099_v34 }
 0xd80   :  { %3881 = vtanh.f32 %v1066_v42 }
 0xd89   :  { %v3880_v37 = vpop.eup %3879 }
 0xd8a   :  { %1103 = vrot.lane.b32.xlu0 %v3880_v37, %s4153_s25  ;;  %v3882_v43 = vpop.eup %3881 }
 0xd8b   :  { %v1068_v44 = vadd.f32 1.0, %v3882_v43  ;;  %v1598_v43 = vld [vmem:[#allocation3 + $0x3] sm:$0x1] }
 0xd8d   :  { %v1069_v46 = vmul.f32 0.5, %v1068_v44 }
 0xd8f   :  { %v1101_v48 = vsub.f32 1.0, %v1069_v46  ;;  %v1107_v51 = vmul.f32 %v1069_v46, %v4461_v40 }
 0xdfc   :  { %v1104_v49 = vpop.permute.xlu0 %1103 }
 0xdfd   :  { %v1106_v52 = vmul.f32 %v1104_v49, %v1101_v48 }
 0xdff   :  { %v4523_v53 = vadd.f32 %v1107_v51, %v1106_v52 }
 0xe01   :  { %1110 = vrot.lane.b32.xlu1 %v4523_v53, %s4153_s25 }
 0xe73   :  { %v1111_v56 = vpop.permute.xlu1 %1110 }
 0xe74   :  { %1113 = vst.msk [vmem:[#allocation2 + $0x1] sm:$0x1] %vm628_vm4, %v1111_v56  ;;  %3506 = vmatmul.mubr.msk.f32.vlgmr.msra.gmra.mrb[12].mxu1 %vm139_vm1, %v1111_v56 }
 0xe75   :  { %3755 = vmatpush3.bf16.msra.mxu1 %v4387_v35  ;;  %3521 = vmatprep.mubr.msk.f32.mxu1 %vm4146_vm0, %v4147_v1 }
 0xe76   :  { %3756 = vmatprep.subr.bf16.mxu1 %v4145_v0 }
 0xe79   :  { %3758 = vmatpush3.bf16.msra.mxu1 %v4392_v39 }
 0xe7a   :  { %3765 = vmatprep.subr.bf16.mxu1 %v4145_v0 }
 0xf47   :  { %v1264_v40 = vpop.f32.mrb[12].mxu1 }
 0xf48   :  { %v1268_v59 = vadd.f32 %v1264_v40, %v1188_v54  ;;  %v3507_v60 = vpop.f32.mrb[13].mxu1 }
 0xf4a   :  { %v1270_v61 = vadd.f32 %v1269_v57, %v1268_v59 }
 0xf4c   :  { %v1271_v62 = vsel %vm293_vm2, %v1270_v61, -inf }
 0xf4d   :  { %1272 = vmax.xlane.f32.xlu0 %v1271_v62  ;;  %v1753_v62 = vld [vmem:[%s4868_s7] sm:$0x1] }
 0xf63   :  { %1363 = vrot.lane.b32.xlu0 %v4347_v13, %s4141_s19 }
 0xfda   :  { %v1273_v63 = vpop.xlane.xlu0 %1272 }
 0xfdb   :  { %v1274_v2 = vsub.f32 %v1270_v61, %v1273_v63 }
 0xfdd   :  { %v1275_v3 = vmul.f32 1.442695, %v1274_v2 }
 0xfde   :  { %v1364_v20 = vpop.permute.xlu0 %1363 }
 0xfdf   :  { %3883 = vpow2.f32 %v1275_v3  ;;  %v1366_v21 = vadd.f32 %v1364_v20, %v1188_v54 }
 0xfe9   :  { %v3884_v4 = vpop.eup %3883 }
 0xfea   :  { %v1277_v6 = vsel %vm293_vm2, %v3884_v4, 0.0 }
 0xfeb   :  { %1278 = vadd.xlane.f32.xlu1 %v1277_v6 }
0x1078   :  { %v1279_v7 = vpop.xlane.xlu1 %1278 }
0x1079   :  { %3885 = vrcp.f32 %v1279_v7 }
0x1083   :  { %v3886_v8 = vpop.eup %3885 }
0x1084   :  { %v1281_v10 = vmul.f32 %v3886_v8, %v3884_v4 }
0x1086   :  { %1282 = vst.msk [vmem:[#allocation17 + $0x2] sm:$0x1] %vm293_vm2, %v1281_v10  ;;  %3511 = vmatmul.mubr.msk.f32.vlgmr.msra.gmra.mrb[10].mxu0 %vm307_vm3, %v1281_v10 }
0x1087   :  { %3761 = vmatpush3.bf16.msra.mxu0 %v4406_v45  ;;  %3532 = vmatprep.mubr.msk.f32.mxu0 %vm4146_vm0, %v4147_v1 }
0x1088   :  { %3762 = vmatprep.subr.bf16.mxu0 %v4145_v0 }
0x108b   :  { %3764 = vmatpush3.bf16.msra.mxu0 %v4409_v47 }
0x108c   :  { %3771 = vmatprep.subr.bf16.mxu0 %v4145_v0 }
0x1159   :  { %v1353_v11 = vpop.f32.mrb[10].mxu0 }
0x115a   :  { %v3512_v15 = vpop.f32.mrb[11].mxu0  ;;  %3522 = vmatmul.mubr.msk.f32.vlgmr.msra.gmra.mrb[14].mxu1 %vm139_vm1, %v1353_v11 }
0x115b   :  { %3767 = vmatpush3.bf16.msra.mxu1 %v4337_v5  ;;  %3543 = vmatprep.mubr.msk.f32.mxu1 %vm4146_vm0, %v4147_v1 }
0x115c   :  { %3768 = vmatprep.subr.bf16.mxu1 %v4145_v0 }
0x115f   :  { %3770 = vmatpush3.bf16.msra.mxu1 %v4342_v12 }
0x1160   :  { %3557 = vmatprep.subr.mxu1 %v4147_v1 }
0x1162   :  { %3544 = vmatmul.mubr.msk.f32.vlgmr.msra.gmra.mrb[16].mxu1 %vm139_vm1, %v1598_v43  ;;  %v2161_v43 = vld [vmem:[#allocation9 + $0x8] sm:$0xff] }
0x1163   :  { %3558 = vmatpush3.msra.mxu1 %v4383_v30  ;;  %3559 = vmatprep.mubr.msk.f32.mxu1 %vm4146_vm0, %v4147_v1 }
0x1164   :  { %3783 = vmatprep.subr.bf16.mxu1 %v4145_v0 }
0x122d   :  { %v1440_v17 = vpop.f32.mrb[14].mxu1 }
0x122e   :  { %1445 = vrot.lane.b32.xlu1 %v1440_v17, %s4141_s19  ;;  %v3523_v18 = vpop.f32.mrb[15].mxu1 }
0x1232   :  { %1570 = vrot.lane.b32.xlu1 %v4416_v50, %s4148_s24 }
0x1235   :  { %v1672_v59 = vpop.f32.mrb[16].mxu1 }
0x1236   :  { %v3545_v60 = vpop.f32.mrb[17].mxu1 }
0x12a0   :  { %v1446_v22 = vpop.permute.xlu1 %1445 }
0x12a1   :  { %v1448_v5 = vadd.f32 %v1446_v22, %v1366_v21 }
0x12a3   :  { %v1449_v23 = vmax.f32 %v1448_v5, 0.0 }
0x12a4   :  { %v1571_v24 = vpop.permute.xlu1 %1570 }
0x12a5   :  { %v1573_v25 = vadd.f32 %v1571_v24, %v1264_v40  ;;  %1455 = vrot.lane.b32.xlu0 %v1449_v23, %s4149_s26 }
0x12a7   :  { %1575 = vrot.lane.b32.xlu1 %v1573_v25, %s4150_s4 }
0x12a9   :  { %1530 = vrot.lane.b32.xlu0 %v1264_v40, %s4149_s26 }
0x12ad   :  { %1560 = vrot.lane.b32.xlu0 %v4431_v58, %s4151_s20 }
0x12b1   :  { %1546 = vrot.lane.b32.xlu0 %v4449_v19, %s4152_s6 }
0x1317   :  { %v1456_v12 = vpop.permute.xlu0 %1455 }
0x1318   :  { %3533 = vmatmul.mubr.msk.f32.vlgmr.msra.gmra.mrb[12].mxu0 %vm139_vm1, %v1456_v12 }
0x1319   :  { %3773 = vmatpush3.bf16.msra.mxu0 %v4339_v9  ;;  %3554 = vmatprep.mubr.msk.f32.mxu0 %vm4146_vm0, %v4147_v1  ;;  %v1576_v36 = vpop.permute.xlu1 %1575 }
0x131a   :  { %3774 = vmatprep.subr.bf16.mxu0 %v4145_v0 }
0x131b   :  { %v1531_v26 = vpop.permute.xlu0 %1530 }
0x131d   :  { %3776 = vmatpush3.bf16.msra.mxu0 %v4351_v14 }
0x131e   :  { %3777 = vmatprep.subr.bf16.mxu0 %v4145_v0 }
0x131f   :  { %v1561_v14 = vpop.permute.xlu0 %1560 }
0x1323   :  { %v1547_v46 = vpop.permute.xlu0 %1546 }
0x13eb   :  { %v1525_v16 = vpop.f32.mrb[12].mxu0 }
0x13ec   :  { %v1533_v28 = vadd.f32 %v1531_v26, %v1525_v16  ;;  %v3534_v29 = vpop.f32.mrb[13].mxu0  ;;  %v1563_v38 = vadd.f32 %v1561_v14, %v1525_v16  ;;  %v2018_v26 = vld [vmem:[%s4870_s9] sm:$0x1]  ;;  %v2083_v14 = vld [vmem:[#allocation8] sm:$0xff] }
0x13ee   :  { %v1535_v31 = vadd.f32 %v1534_v27, %v1533_v28  ;;  %v1549_v48 = vadd.f32 %v1547_v46, %v1533_v28  ;;  %v2086_v46 = vld [vmem:[#allocation8 + $0x18] sm:$0xff] }
0x13f0   :  { %v1536_v32 = vmul.f32 0.5, %v1535_v31  ;;  %v1550_v49 = vmul.f32 0.5, %v1549_v48 }
0x13f2   :  { %3887 = vtanh.f32 %v1536_v32 }
0x13fc   :  { %v3888_v9 = vpop.eup %3887 }
0x13fd   :  { %v1538_v33 = vadd.f32 1.0, %v3888_v9 }
0x13ff   :  { %v1539_v34 = vmul.f32 0.5, %v1538_v33 }
0x1401   :  { %v1578_v37 = vmul.f32 %v1576_v36, %v1539_v34 }
0x1403   :  { %1580 = vrot.lane.b32.xlu1 %v1578_v37, %s4151_s20 }
0x1475   :  { %v1581_v41 = vpop.permute.xlu1 %1580 }
0x1476   :  { %v1583_v42 = vadd.f32 %v1581_v41, %v1563_v38  ;;  %v2084_v38 = vld [vmem:[#allocation8 + $0x8] sm:$0xff]  ;;  %v2160_v41 = vld [vmem:[#allocation9] sm:$0xff] }
0x1477   :  { %v4634_v48 = vpack.c.bf16 %v2161_v43, %v2160_v41 }
0x1478   :  { %3889 = vtanh.f32 %v1583_v42  ;;  %v4632_v42 = vpack.c.bf16 %v2084_v38, %v2083_v14 }
0x1479   :  { %3891 = vtanh.f32 %v1550_v49  ;;  %v2162_v49 = vld [vmem:[#allocation9 + $0x10] sm:$0xff] }
0x1482   :  { %v3890_v44 = vpop.eup %3889 }
0x1483   :  { %1587 = vrot.lane.b32.xlu1 %v3890_v44, %s4153_s25  ;;  %v3892_v51 = vpop.eup %3891  ;;  %v2085_v44 = vld [vmem:[#allocation8 + $0x10] sm:$0xff] }
0x1484   :  { %v1552_v52 = vadd.f32 1.0, %v3892_v51  ;;  %v2163_v51 = vld [vmem:[#allocation9 + $0x18] sm:$0xff] }
0x1486   :  { %v1553_v54 = vmul.f32 0.5, %v1552_v52  ;;  %v4637_v52 = vpack.c.bf16 %v2086_v46, %v2085_v44  ;;  %v4727_v46 = vld [vmem:[%s4872_s11] ss:$0 sm:$0xff] }
0x1488   :  { %v1585_v55 = vsub.f32 1.0, %v1553_v54  ;;  %v1591_v40 = vmul.f32 %v1553_v54, %v4523_v53  ;;  %v4641_v54 = vpack.c.bf16 %v2163_v51, %v2162_v49  ;;  %v4734_v49 = vld [vmem:[%s4871_s10] ss:$0 sm:$0xff] }
0x14f5   :  { %v1588_v56 = vpop.permute.xlu1 %1587 }
0x14f6   :  { %v1590_v30 = vmul.f32 %v1588_v56, %v1585_v55  ;;  %v2082_v55 = vld [vmem:[#allocation3 + $0x4] sm:$0x1] }
0x14f8   :  { %v4585_v57 = vadd.f32 %v1591_v40, %v1590_v30 }
0x14fa   :  { %1594 = vrot.lane.b32.xlu0 %v4585_v57, %s4153_s25 }
0x156c   :  { %v1595_v61 = vpop.permute.xlu0 %1594 }
0x156d   :  { %1597 = vst.msk [vmem:[#allocation2 + $0x2] sm:$0x1] %vm628_vm4, %v1595_v61  ;;  %3555 = vmatmul.mubr.msk.f32.vlgmr.msra.gmra.mrb[14].mxu0 %vm139_vm1, %v1595_v61 }
0x156e   :  { %3779 = vmatpush3.bf16.msra.mxu0 %v4387_v35  ;;  %3570 = vmatprep.mubr.msk.f32.mxu0 %vm4146_vm0, %v4147_v1 }
0x156f   :  { %3780 = vmatprep.subr.bf16.mxu0 %v4145_v0 }
0x1572   :  { %3782 = vmatpush3.bf16.msra.mxu0 %v4392_v39 }
0x1573   :  { %3789 = vmatprep.subr.bf16.mxu0 %v4145_v0 }
0x1640   :  { %v1748_v53 = vpop.f32.mrb[14].mxu0 }
0x1641   :  { %v1752_v63 = vadd.f32 %v1748_v53, %v1672_v59  ;;  %v3556_v2 = vpop.f32.mrb[15].mxu0 }
0x1643   :  { %v1754_v3 = vadd.f32 %v1753_v62, %v1752_v63 }
0x1645   :  { %v1755_v4 = vsel %vm293_vm2, %v1754_v3, -inf }
0x1646   :  { %1756 = vmax.xlane.f32.xlu1 %v1755_v4 }
0x16d3   :  { %v1757_v35 = vpop.xlane.xlu1 %1756 }
0x16d4   :  { %v1758_v6 = vsub.f32 %v1754_v3, %v1757_v35 }
0x16d6   :  { %v1759_v7 = vmul.f32 1.442695, %v1758_v6 }
0x16d8   :  { %3893 = vpow2.f32 %v1759_v7 }
0x16e2   :  { %v3894_v8 = vpop.eup %3893 }
0x16e3   :  { %v1761_v39 = vsel %vm293_vm2, %v3894_v8, 0.0 }
0x16e4   :  { %1762 = vadd.xlane.f32.xlu0 %v1761_v39 }
0x16fa   :  { %1847 = vrot.lane.b32.xlu0 %v4347_v13, %s4141_s19 }
0x16fe   :  { %2054 = vrot.lane.b32.xlu0 %v4416_v50, %s4148_s24 }
0x1771   :  { %v1763_v10 = vpop.xlane.xlu0 %1762 }
0x1772   :  { %3895 = vrcp.f32 %v1763_v10 }
0x1775   :  { %v1848_v11 = vpop.permute.xlu0 %1847 }
0x1776   :  { %v1850_v15 = vadd.f32 %v1848_v11, %v1672_v59 }
0x1779   :  { %v2055_v17 = vpop.permute.xlu0 %2054 }
0x177a   :  { %v2057_v18 = vadd.f32 %v2055_v17, %v1748_v53  ;;  %v4674_v17 = vld [vmem:[%s4869_s8] ss:$0 sm:$0xff] }
0x177c   :  { %v3896_v20 = vpop.eup %3895  ;;  %2059 = vrot.lane.b32.xlu0 %v2057_v18, %s4150_s4 }
0x177d   :  { %v1765_v21 = vmul.f32 %v3896_v20, %v3894_v8 }
0x177f   :  { %1766 = vst.msk [vmem:[#allocation17 + $0x3] sm:$0x1] %vm293_vm2, %v1765_v21  ;;  %3560 = vmatmul.mubr.msk.f32.vlgmr.msra.gmra.mrb[18].mxu1 %vm307_vm3, %v1765_v21 }
0x1780   :  { %3785 = vmatpush3.bf16.msra.mxu1 %v4406_v45  ;;  %3581 = vmatprep.mubr.msk.f32.mxu1 %vm4146_vm0, %v4147_v1 }
0x1781   :  { %3786 = vmatprep.subr.bf16.mxu1 %v4145_v0 }
0x1784   :  { %3788 = vmatpush3.bf16.msra.mxu1 %v4409_v47 }
0x1785   :  { %3795 = vmatprep.subr.bf16.mxu1 %v4145_v0 }
0x17ee   :  { %v2060_v32 = vpop.permute.xlu0 %2059 }
0x1852   :  { %v1837_v13 = vpop.f32.mrb[18].mxu1 }
0x1853   :  { %v3561_v50 = vpop.f32.mrb[19].mxu1  ;;  %3571 = vmatmul.mubr.msk.f32.vlgmr.msra.gmra.mrb[16].mxu0 %vm139_vm1, %v1837_v13 }
0x1854   :  { %3592 = vmatprep.mubr.msk.f32.mxu0 %vm4146_vm0, %v4147_v1  ;;  %3791 = vmatpush3.bf16.msra.mxu0 %v4632_v42 }
0x1855   :  { %3792 = vmatprep.subr.bf16.mxu0 %v4145_v0 }
0x1858   :  { %3794 = vmatpush3.bf16.msra.mxu0 %v4637_v52 }
0x1859   :  { %3606 = vmatprep.subr.mxu0 %v4147_v1 }
0x185b   :  { %3593 = vmatmul.mubr.msk.f32.vlgmr.msra.gmra.mrb[18].mxu0 %vm139_vm1, %v2082_v55 }
0x185c   :  { %3608 = vmatprep.mubr.msk.f32.mxu0 %vm4146_vm0, %v4147_v1 }
0x1926   :  { %v1924_v22 = vpop.f32.mrb[16].mxu0 }
0x1927   :  { %1929 = vrot.lane.b32.xlu1 %v1924_v22, %s4141_s19  ;;  %v3572_v45 = vpop.f32.mrb[17].mxu0  ;;  %v4679_v22 = vld [vmem:[#allocation6] sm:$0xff] }
0x1928   :  { %3607 = vmatpush3.msra.mxu0 %v4679_v22  ;;  %v2335_v45 = vld [vmem:[#allocation12] sm:$0xff] }
0x1929   :  { %3807 = vmatprep.subr.bf16.mxu0 %v4145_v0 }
0x192e   :  { %v4657_v35 = vpop.f32.mrb[18].mxu0 }
0x192f   :  { %v3594_v6 = vpop.f32.mrb[19].mxu0 }
0x1930   :  { %v2566_v6 = vld [vmem:[#allocation3 + $0x5] sm:$0x1] }
0x1999   :  { %v1930_v5 = vpop.permute.xlu1 %1929 }
0x199a   :  { %v1932_v23 = vadd.f32 %v1930_v5, %v1850_v15  ;;  %v2336_v5 = vld [vmem:[#allocation12 + $0x8] sm:$0xff] }
0x199c   :  { %v1933_v24 = vmax.f32 %v1932_v23, 0.0  ;;  %v2337_v23 = vld [vmem:[#allocation12 + $0x10] sm:$0xff] }
0x199e   :  { %1939 = vrot.lane.b32.xlu1 %v1933_v24, %s4149_s26  ;;  %v4682_v24 = vpack.c.bf16 %v2336_v5, %v2335_v45 }
0x19a2   :  { %2014 = vrot.lane.b32.xlu1 %v1748_v53, %s4149_s26 }
0x19a6   :  { %2044 = vrot.lane.b32.xlu1 %v4431_v58, %s4151_s20 }
0x19aa   :  { %2030 = vrot.lane.b32.xlu1 %v4449_v19, %s4152_s6 }
0x1a10   :  { %v1940_v47 = vpop.permute.xlu1 %1939 }
0x1a11   :  { %3582 = vmatmul.mubr.msk.f32.vlgmr.msra.gmra.mrb[20].mxu1 %vm139_vm1, %v1940_v47  ;;  %v2338_v47 = vld [vmem:[#allocation12 + $0x18] sm:$0xff] }
0x1a12   :  { %3603 = vmatprep.mubr.msk.f32.mxu1 %vm4146_vm0, %v4147_v1  ;;  %3797 = vmatpush3.bf16.msra.mxu1 %v4634_v48 }
0x1a13   :  { %3798 = vmatprep.subr.bf16.mxu1 %v4145_v0 }
0x1a14   :  { %v2015_v25 = vpop.permute.xlu1 %2014 }
0x1a16   :  { %3800 = vmatpush3.bf16.msra.mxu1 %v4641_v54 }
0x1a17   :  { %3801 = vmatprep.subr.bf16.mxu1 %v4145_v0 }
0x1a18   :  { %v2045_v33 = vpop.permute.xlu1 %2044 }
0x1a1c   :  { %v2031_v40 = vpop.permute.xlu1 %2030 }
0x1ae4   :  { %v2009_v12 = vpop.f32.mrb[20].mxu1 }
0x1ae5   :  { %v2017_v16 = vadd.f32 %v2015_v25, %v2009_v12  ;;  %v3583_v27 = vpop.f32.mrb[21].mxu1  ;;  %v2047_v34 = vadd.f32 %v2045_v33, %v2009_v12  ;;  %v4686_v25 = vpack.c.bf16 %v2338_v47, %v2337_v23  ;;  %v2721_v23 = vld [vmem:[%s4868_s7] sm:$0x1] }
0x1ae7   :  { %v2019_v28 = vadd.f32 %v2018_v26, %v2017_v16  ;;  %v2033_v30 = vadd.f32 %v2031_v40, %v2017_v16 }
0x1ae9   :  { %v2020_v29 = vmul.f32 0.5, %v2019_v28  ;;  %v2034_v59 = vmul.f32 0.5, %v2033_v30 }
0x1aeb   :  { %3897 = vtanh.f32 %v2020_v29  ;;  %v2418_v29 = vld [vmem:[#allocation11] sm:$0xff] }
0x1af5   :  { %v3898_v58 = vpop.eup %3897 }
0x1af6   :  { %v2022_v31 = vadd.f32 1.0, %v3898_v58  ;;  %v2419_v58 = vld [vmem:[#allocation11 + $0x8] sm:$0xff] }
0x1af8   :  { %v2023_v19 = vmul.f32 0.5, %v2022_v31  ;;  %v2420_v31 = vld [vmem:[#allocation11 + $0x10] sm:$0xff] }
0x1afa   :  { %v2062_v9 = vmul.f32 %v2060_v32, %v2023_v19  ;;  %v4702_v19 = vpack.c.bf16 %v2419_v58, %v2418_v29  ;;  %v2421_v32 = vld [vmem:[#allocation11 + $0x18] sm:$0xff] }
0x1afc   :  { %2064 = vrot.lane.b32.xlu0 %v2062_v9, %s4151_s20  ;;  %v4705_v9 = vpack.c.bf16 %v2421_v32, %v2420_v31 }
0x1b6e   :  { %v2065_v36 = vpop.permute.xlu0 %2064 }
0x1b6f   :  { %v2067_v37 = vadd.f32 %v2065_v36, %v2047_v34  ;;  %v4712_v36 = vld [vmem:[%s4873_s12] ss:$0 sm:$0xff] }
0x1b71   :  { %3899 = vtanh.f32 %v2067_v37 }
0x1b72   :  { %3901 = vtanh.f32 %v2034_v59 }
0x1b7b   :  { %v3900_v56 = vpop.eup %3899 }
0x1b7c   :  { %2071 = vrot.lane.b32.xlu0 %v3900_v56, %s4153_s25  ;;  %v3902_v60 = vpop.eup %3901  ;;  %v2502_v56 = vld [vmem:[%s4870_s9] sm:$0x1] }
0x1b7d   :  { %v2036_v61 = vadd.f32 1.0, %v3902_v60 }
0x1b7f   :  { %v2037_v53 = vmul.f32 0.5, %v2036_v61 }
0x1b81   :  { %v2069_v62 = vsub.f32 1.0, %v2037_v53  ;;  %v2075_v2 = vmul.f32 %v2037_v53, %v4585_v57  ;;  %v2237_v57 = vld [vmem:[%s4868_s7] sm:$0x1] }
0x1bee   :  { %v2072_v63 = vpop.permute.xlu0 %2071 }
0x1bef   :  { %v2074_v3 = vmul.f32 %v2072_v63, %v2069_v62 }
0x1bf1   :  { %v4653_v4 = vadd.f32 %v2075_v2, %v2074_v3 }
0x1bf3   :  { %2078 = vrot.lane.b32.xlu1 %v4653_v4, %s4153_s25 }
0x1c65   :  { %v2079_v7 = vpop.permute.xlu1 %2078 }
0x1c66   :  { %2081 = vst.msk [vmem:[#allocation2 + $0x3] sm:$0x1] %vm628_vm4, %v2079_v7  ;;  %3604 = vmatmul.mubr.msk.f32.vlgmr.msra.gmra.mrb[22].mxu1 %vm139_vm1, %v2079_v7 }
0x1c67   :  { %3619 = vmatprep.mubr.msk.f32.mxu1 %vm4146_vm0, %v4147_v1  ;;  %3803 = vmatpush3.bf16.msra.mxu1 %v4682_v24 }
0x1c68   :  { %3804 = vmatprep.subr.bf16.mxu1 %v4145_v0 }
0x1c6b   :  { %3806 = vmatpush3.bf16.msra.mxu1 %v4686_v25 }
0x1c6c   :  { %3813 = vmatprep.subr.bf16.mxu1 %v4145_v0 }
0x1d39   :  { %v4663_v8 = vpop.f32.mrb[22].mxu1 }
0x1d3a   :  { %v2236_v39 = vadd.f32 %v4663_v8, %v4657_v35  ;;  %v3605_v10 = vpop.f32.mrb[23].mxu1 }
0x1d3c   :  { %v2238_v11 = vadd.f32 %v2237_v57, %v2236_v39 }
0x1d3e   :  { %v2239_v15 = vsel %vm293_vm2, %v2238_v11, -inf }
0x1d3f   :  { %2240 = vmax.xlane.f32.xlu0 %v2239_v15 }
0x1d55   :  { %2331 = vrot.lane.b32.xlu0 %v4674_v17, %s4141_s19 }
0x1dcc   :  { %v2241_v18 = vpop.xlane.xlu0 %2240 }
0x1dcd   :  { %v2242_v20 = vsub.f32 %v2238_v11, %v2241_v18 }
0x1dcf   :  { %v2243_v21 = vmul.f32 1.442695, %v2242_v20 }
0x1dd0   :  { %v2332_v37 = vpop.permute.xlu0 %2331 }
0x1dd1   :  { %3903 = vpow2.f32 %v2243_v21  ;;  %v2334_v14 = vadd.f32 %v2332_v37, %v4657_v35 }
0x1ddb   :  { %v3904_v13 = vpop.eup %3903 }
0x1ddc   :  { %v2245_v50 = vsel %vm293_vm2, %v3904_v13, 0.0 }
0x1ddd   :  { %2246 = vadd.xlane.f32.xlu1 %v2245_v50 }
0x1e6a   :  { %v2247_v12 = vpop.xlane.xlu1 %2246 }
0x1e6b   :  { %3905 = vrcp.f32 %v2247_v12 }
0x1e75   :  { %v3906_v26 = vpop.eup %3905 }
0x1e76   :  { %v2249_v16 = vmul.f32 %v3906_v26, %v3904_v13 }
0x1e78   :  { %2250 = vst.msk [vmem:[#allocation17 + $0x4] sm:$0x1] %vm293_vm2, %v2249_v16  ;;  %3609 = vmatmul.mubr.msk.f32.vlgmr.msra.gmra.mrb[20].mxu0 %vm307_vm3, %v2249_v16 }
0x1e79   :  { %3630 = vmatprep.mubr.msk.f32.mxu0 %vm4146_vm0, %v4147_v1  ;;  %3809 = vmatpush3.bf16.msra.mxu0 %v4702_v19 }
0x1e7a   :  { %3810 = vmatprep.subr.bf16.mxu0 %v4145_v0 }
0x1e7d   :  { %3812 = vmatpush3.bf16.msra.mxu0 %v4705_v9 }
0x1e7e   :  { %3819 = vmatprep.subr.bf16.mxu0 %v4145_v0 }
0x1f4b   :  { %v2321_v27 = vpop.f32.mrb[20].mxu0 }
0x1f4c   :  { %v3610_v28 = vpop.f32.mrb[21].mxu0  ;;  %3620 = vmatmul.mubr.msk.f32.vlgmr.msra.gmra.mrb[24].mxu1 %vm139_vm1, %v2321_v27 }
0x1f4d   :  { %3815 = vmatpush3.bf16.msra.mxu1 %v4632_v42  ;;  %3641 = vmatprep.mubr.msk.f32.mxu1 %vm4146_vm0, %v4147_v1 }
0x1f4e   :  { %3816 = vmatprep.subr.bf16.mxu1 %v4145_v0 }
0x1f51   :  { %3818 = vmatpush3.bf16.msra.mxu1 %v4637_v52 }
0x1f52   :  { %3655 = vmatprep.subr.mxu1 %v4147_v1 }
0x1f54   :  { %3642 = vmatmul.mubr.msk.f32.vlgmr.msra.gmra.mrb[26].mxu1 %vm139_vm1, %v2566_v6 }
0x1f55   :  { %3656 = vmatpush3.msra.mxu1 %v4679_v22  ;;  %3657 = vmatprep.mubr.msk.f32.mxu1 %vm4146_vm0, %v4147_v1 }
0x1f56   :  { %3831 = vmatprep.subr.bf16.mxu1 %v4145_v0 }
0x201f   :  { %v2408_v33 = vpop.f32.mrb[24].mxu1 }
0x2020   :  { %2413 = vrot.lane.b32.xlu1 %v2408_v33, %s4141_s19  ;;  %v3621_v34 = vpop.f32.mrb[25].mxu1 }
0x2024   :  { %2538 = vrot.lane.b32.xlu1 %v4712_v36, %s4148_s24 }
0x2027   :  { %v2640_v22 = vpop.f32.mrb[26].mxu1 }
0x2028   :  { %v3643_v45 = vpop.f32.mrb[27].mxu1 }
0x2092   :  { %v2414_v38 = vpop.permute.xlu1 %2413 }
0x2093   :  { %v2416_v41 = vadd.f32 %v2414_v38, %v2334_v14 }
0x2095   :  { %v2417_v42 = vmax.f32 %v2416_v41, 0.0 }
0x2096   :  { %v2539_v43 = vpop.permute.xlu1 %2538 }
0x2097   :  { %v2541_v44 = vadd.f32 %v2539_v43, %v4663_v8  ;;  %2423 = vrot.lane.b32.xlu0 %v2417_v42, %s4149_s26 }
0x2099   :  { %2543 = vrot.lane.b32.xlu1 %v2541_v44, %s4150_s4 }
0x209b   :  { %2498 = vrot.lane.b32.xlu0 %v4663_v8, %s4149_s26 }
0x209f   :  { %2528 = vrot.lane.b32.xlu0 %v4727_v46, %s4151_s20 }
0x20a3   :  { %2514 = vrot.lane.b32.xlu0 %v4734_v49, %s4152_s6 }
0x2109   :  { %v2424_v51 = vpop.permute.xlu0 %2423 }
0x210a   :  { %3631 = vmatmul.mubr.msk.f32.vlgmr.msra.gmra.mrb[22].mxu0 %vm139_vm1, %v2424_v51  ;;  %v2986_v51 = vld [vmem:[%s4870_s9] sm:$0x1] }
0x210b   :  { %3821 = vmatpush3.bf16.msra.mxu0 %v4634_v48  ;;  %3652 = vmatprep.mubr.msk.f32.mxu0 %vm4146_vm0, %v4147_v1  ;;  %v2544_v62 = vpop.permute.xlu1 %2543 }
0x210c   :  { %3822 = vmatprep.subr.bf16.mxu0 %v4145_v0 }
0x210d   :  { %v2499_v52 = vpop.permute.xlu0 %2498 }
0x210f   :  { %3824 = vmatpush3.bf16.msra.mxu0 %v4641_v54 }
0x2110   :  { %3825 = vmatprep.subr.bf16.mxu0 %v4145_v0 }
0x2111   :  { %v2529_v54 = vpop.permute.xlu0 %2528 }
0x2115   :  { %v2515_v8 = vpop.permute.xlu0 %2514 }
0x21dd   :  { %v2493_v55 = vpop.f32.mrb[22].mxu0 }
0x21de   :  { %v2501_v40 = vadd.f32 %v2499_v52, %v2493_v55  ;;  %v3632_v30 = vpop.f32.mrb[23].mxu0  ;;  %v2531_v2 = vadd.f32 %v2529_v54, %v2493_v55 }
0x21e0   :  { %v2503_v59 = vadd.f32 %v2502_v56, %v2501_v40  ;;  %v2517_v57 = vadd.f32 %v2515_v8, %v2501_v40  ;;  %v3053_v8 = vld [vmem:[%s4874_s13 + $0x8] sm:$0xff] }
0x21e2   :  { %v2504_v60 = vmul.f32 0.5, %v2503_v59  ;;  %v2518_v39 = vmul.f32 0.5, %v2517_v57 }
0x21e4   :  { %3907 = vtanh.f32 %v2504_v60 }
0x21ee   :  { %v3908_v48 = vpop.eup %3907 }
0x21ef   :  { %v2506_v61 = vadd.f32 1.0, %v3908_v48 }
0x21f1   :  { %v2507_v53 = vmul.f32 0.5, %v2506_v61 }
0x21f3   :  { %v2546_v63 = vmul.f32 %v2544_v62, %v2507_v53 }
0x21f5   :  { %2548 = vrot.lane.b32.xlu1 %v2546_v63, %s4151_s20 }
0x2267   :  { %v2549_v3 = vpop.permute.xlu1 %2548 }
0x2268   :  { %v2551_v35 = vadd.f32 %v2549_v3, %v2531_v2 }
0x226a   :  { %3909 = vtanh.f32 %v2551_v35 }
0x226b   :  { %3911 = vtanh.f32 %v2518_v39  ;;  %v3054_v39 = vld [vmem:[%s4874_s13 + $0x10] sm:$0xff] }
0x2274   :  { %v3910_v7 = vpop.eup %3909 }
0x2275   :  { %2555 = vrot.lane.b32.xlu1 %v3910_v7, %s4153_s25  ;;  %v3912_v10 = vpop.eup %3911  ;;  %v3052_v7 = vld [vmem:[%s4874_s13] sm:$0xff] }
0x2276   :  { %v2520_v11 = vadd.f32 1.0, %v3912_v10  ;;  %v3838_v57 = vpack.c.bf16 %v3053_v8, %v3052_v7  ;;  %v3055_v10 = vld [vmem:[%s4874_s13 + $0x18] sm:$0xff] }
0x2278   :  { %v2521_v15 = vmul.f32 0.5, %v2520_v11  ;;  %v3841_v11 = vpack.c.bf16 %v3055_v10, %v3054_v39 }
0x227a   :  { %v2553_v18 = vsub.f32 1.0, %v2521_v15  ;;  %v2559_v21 = vmul.f32 %v2521_v15, %v4653_v4 }
0x22e7   :  { %v2556_v20 = vpop.permute.xlu1 %2555 }
0x22e8   :  { %v2558_v13 = vmul.f32 %v2556_v20, %v2553_v18 }
0x22ea   :  { %v4756_v50 = vadd.f32 %v2559_v21, %v2558_v13 }
0x22ec   :  { %2562 = vrot.lane.b32.xlu0 %v4756_v50, %s4153_s25 }
0x235e   :  { %v2563_v5 = vpop.permute.xlu0 %2562 }
0x235f   :  { %2565 = vst.msk [vmem:[#allocation2 + $0x4] sm:$0x1] %vm628_vm4, %v2563_v5  ;;  %3653 = vmatmul.mubr.msk.f32.vlgmr.msra.gmra.mrb[24].mxu0 %vm139_vm1, %v2563_v5 }
0x2360   :  { %3827 = vmatpush3.bf16.msra.mxu0 %v4682_v24  ;;  %3668 = vmatprep.mubr.msk.f32.mxu0 %vm4146_vm0, %v4147_v1 }
0x2361   :  { %3828 = vmatprep.subr.bf16.mxu0 %v4145_v0 }
0x2364   :  { %3830 = vmatpush3.bf16.msra.mxu0 %v4686_v25 }
0x2365   :  { %3837 = vmatprep.subr.bf16.mxu0 %v4145_v0 }
0x2432   :  { %v2716_v4 = vpop.f32.mrb[24].mxu0 }
0x2433   :  { %v2720_v47 = vadd.f32 %v2716_v4, %v2640_v22  ;;  %v3654_v12 = vpop.f32.mrb[25].mxu0 }
0x2435   :  { %v2722_v26 = vadd.f32 %v2721_v23, %v2720_v47 }
0x2437   :  { %v2723_v16 = vsel %vm293_vm2, %v2722_v26, -inf }
0x2438   :  { %2724 = vmax.xlane.f32.xlu1 %v2723_v16 }
0x24c5   :  { %v2725_v24 = vpop.xlane.xlu1 %2724 }
0x24c6   :  { %v2726_v27 = vsub.f32 %v2722_v26, %v2725_v24 }
0x24c8   :  { %v2727_v28 = vmul.f32 1.442695, %v2726_v27 }
0x24ca   :  { %3913 = vpow2.f32 %v2727_v28 }
0x24d4   :  { %v3914_v29 = vpop.eup %3913 }
0x24d5   :  { %v2729_v25 = vsel %vm293_vm2, %v3914_v29, 0.0 }
0x24d6   :  { %2730 = vadd.xlane.f32.xlu0 %v2729_v25 }
0x24ec   :  { %2815 = vrot.lane.b32.xlu0 %v4674_v17, %s4141_s19 }
0x24f0   :  { %3022 = vrot.lane.b32.xlu0 %v4712_v36, %s4148_s24 }
0x2563   :  { %v2731_v58 = vpop.xlane.xlu0 %2730 }
0x2564   :  { %3915 = vrcp.f32 %v2731_v58 }
0x2567   :  { %v2816_v31 = vpop.permute.xlu0 %2815 }
0x2568   :  { %v2818_v32 = vadd.f32 %v2816_v31, %v2640_v22 }
0x256b   :  { %v3023_v33 = vpop.permute.xlu0 %3022 }
0x256c   :  { %v3025_v34 = vadd.f32 %v3023_v33, %v2716_v4 }
0x256e   :  { %v3916_v37 = vpop.eup %3915  ;;  %3027 = vrot.lane.b32.xlu0 %v3025_v34, %s4150_s4 }
0x256f   :  { %v2733_v14 = vmul.f32 %v3916_v37, %v3914_v29 }
0x2571   :  { %2734 = vst.msk [vmem:[#allocation17 + $0x5] sm:$0x1] %vm293_vm2, %v2733_v14  ;;  %3658 = vmatmul.mubr.msk.f32.vlgmr.msra.gmra.mrb[28].mxu1 %vm307_vm3, %v2733_v14 }
0x2572   :  { %3833 = vmatpush3.bf16.msra.mxu1 %v4702_v19  ;;  %3679 = vmatprep.mubr.msk.f32.mxu1 %vm4146_vm0, %v4147_v1 }
0x2573   :  { %3834 = vmatprep.subr.bf16.mxu1 %v4145_v0 }
0x2576   :  { %3836 = vmatpush3.bf16.msra.mxu1 %v4705_v9 }
0x25e0   :  { %v3028_v60 = vpop.permute.xlu0 %3027 }
0x2644   :  { %v2805_v17 = vpop.f32.mrb[28].mxu1 }
0x2645   :  { %v3659_v36 = vpop.f32.mrb[29].mxu1  ;;  %3669 = vmatmul.mubr.msk.f32.vlgmr.msra.gmra.mrb[26].mxu0 %vm139_vm1, %v2805_v17 }
0x2646   :  { %3690 = vmatprep.mubr.msk.f32.mxu0 %vm4146_vm0, %v4147_v1  ;;  %3839 = vmatpush3.bf16.msra.mxu0 %v3838_v57 }
0x2647   :  { %3840 = vmatprep.subr.bf16.mxu0 %v4145_v0  ;;  %v3249_v0 = vld [vmem:[%s4875_s14] ss:$0 sm:$0xff] }
0x264a   :  { %3842 = vmatpush3.bf16.msra.mxu0 %v3841_v11 }
0x2718   :  { %v2892_v38 = vpop.f32.mrb[26].mxu0 }
0x2719   :  { %2897 = vrot.lane.b32.xlu1 %v2892_v38, %s4141_s19  ;;  %v3670_v41 = vpop.f32.mrb[27].mxu0 }
0x278b   :  { %v2898_v42 = vpop.permute.xlu1 %2897 }
0x278c   :  { %v2900_v19 = vadd.f32 %v2898_v42, %v2818_v32 }
0x278e   :  { %v2901_v43 = vmax.f32 %v2900_v19, 0.0 }
0x2790   :  { %2907 = vrot.lane.b32.xlu1 %v2901_v43, %s4149_s26 }
0x2794   :  { %2982 = vrot.lane.b32.xlu1 %v2716_v4, %s4149_s26 }
0x2798   :  { %3012 = vrot.lane.b32.xlu1 %v4727_v46, %s4151_s20 }
0x279c   :  { %2998 = vrot.lane.b32.xlu1 %v4734_v49, %s4152_s6 }
0x2802   :  { %v2908_v9 = vpop.permute.xlu1 %2907 }
0x2803   :  { %3680 = vmatmul.mubr.msk.f32.vlgmr.msra.gmra.mrb[30].mxu1 %vm139_vm1, %v2908_v9 }
0x2806   :  { %v2983_v1 = vpop.permute.xlu1 %2982 }
0x280a   :  { %v3013_v49 = vpop.permute.xlu1 %3012 }
0x280e   :  { %v2999_v54 = vpop.permute.xlu1 %2998 }
0x28d6   :  { %v2977_v44 = vpop.f32.mrb[30].mxu1 }
0x28d7   :  { %v2985_v52 = vadd.f32 %v2983_v1, %v2977_v44  ;;  %v3681_v55 = vpop.f32.mrb[31].mxu1  ;;  %v3015_v61 = vadd.f32 %v3013_v49, %v2977_v44 }
0x28d9   :  { %v2987_v56 = vadd.f32 %v2986_v51, %v2985_v52  ;;  %v3001_v2 = vadd.f32 %v2999_v54, %v2985_v52 }
0x28db   :  { %v2988_v40 = vmul.f32 0.5, %v2987_v56  ;;  %v3002_v3 = vmul.f32 0.5, %v3001_v2 }
0x28dd   :  { %3917 = vtanh.f32 %v2988_v40 }
0x28e7   :  { %v3918_v30 = vpop.eup %3917 }
0x28e8   :  { %v2990_v59 = vadd.f32 1.0, %v3918_v30 }
0x28ea   :  { %v2991_v46 = vmul.f32 0.5, %v2990_v59 }
0x28ec   :  { %v3030_v48 = vmul.f32 %v3028_v60, %v2991_v46 }
0x28ee   :  { %3032 = vrot.lane.b32.xlu0 %v3030_v48, %s4151_s20 }
0x2960   :  { %v3033_v53 = vpop.permute.xlu0 %3032 }
0x2961   :  { %v3035_v62 = vadd.f32 %v3033_v53, %v3015_v61 }
0x2963   :  { %3919 = vtanh.f32 %v3035_v62 }
0x2964   :  { %3921 = vtanh.f32 %v3002_v3 }
0x296d   :  { %v3920_v63 = vpop.eup %3919 }
0x296e   :  { %3039 = vrot.lane.b32.xlu0 %v3920_v63, %s4153_s25  ;;  %v3922_v35 = vpop.eup %3921 }
0x296f   :  { %v3004_v6 = vadd.f32 1.0, %v3922_v35 }
0x2971   :  { %v3005_v15 = vmul.f32 0.5, %v3004_v6 }
0x2973   :  { %v3037_v18 = vsub.f32 1.0, %v3005_v15  ;;  %v3043_v21 = vmul.f32 %v3005_v15, %v4756_v50 }
0x29e0   :  { %v3040_v20 = vpop.permute.xlu0 %3039 }
0x29e1   :  { %v3042_v13 = vmul.f32 %v3040_v20, %v3037_v18 }
0x29e3   :  { %v3044_v22 = vadd.f32 %v3043_v21, %v3042_v13 }
0x29e5   :  { %3046 = vrot.lane.b32.xlu1 %v3044_v22, %s4153_s25  ;;  %s4154_s25 = smov [#allocation15]  }
0x29e6   :  { %s3166_s21 = sshll.u32 %s4154_s25, 4  ;;  %s3167_s21 = int_to_ptr.vmem [resolvable:$true] %s3166_s21 }
0x29e7   :  { %s4059_s28 = scalar_lea.vmem %s3167_s21, 16  ;;  %s4063_s14 = scalar_lea.vmem %s3167_s21, 32 }
0x29e8   :  { %p4060_p6 = scmp.ne.s32.totalorder %s3167_s21, %s4059_s28  ;;  %p4064_p7 = scmp.lt.s32.totalorder %s3167_s21, %s3167_s21 }
0x29e9   :  { %p4065_p8 = scmp.lt.s32.totalorder %s4063_s14, %s4059_s28 }
0x29eb   :  { %p4066_p9 = por %p4065_p8, %p4064_p7 }
0x29ed   :  { %p4067_p10 = pnand %p4066_p9, %p4060_p6 }
0x2a57   :  { %v3047_v45 = vpop.permute.xlu1 %3046 }
0x2a58   :  { %3049 = vst.msk [vmem:[#allocation2 + $0x5] sm:$0x1] %vm628_vm4, %v3047_v45  ;;  %3050 = vst.msk [vmem:[#allocation15] sm:$0x1] %vm628_vm4, %v3047_v45 }
0x2a5f   :  { %v3051_v5 = vld [vmem:[#allocation2] sm:$0x3f] }
0x2a60   :  { %3691 = vmatmul.mubr.msk.f32.vlgmr.msra.gmra.mrb[28].mxu0 %vm139_vm1, %v3051_v5 }
0x2b33   :  { %v3132_v4 = vpop.f32.mrb[28].mxu0 }
0x2b34   :  { %v3133_v23 = vadd.f32 %v3249_v0, %v3132_v4  ;;  %v3692_v50 = vpop.f32.mrb[29].mxu0 }
0x2b36   :  { %v3137_v47 = vsel %vm3136_vm5, %v3133_v23, -inf }
0x2b37   :  { %3138 = vmax.xlane.f32.xlu0 %v3137_v47 }
0x2bc4   :  { %v3139_v12 = vpop.xlane.xlu0 %3138 }
0x2bc5   :  { %v3140_v26 = vsub.f32 %v3133_v23, %v3139_v12 }
0x2bc7   :  { %v3141_v16 = vmul.f32 1.442695, %v3140_v26 }
0x2bc9   :  { %3923 = vpow2.f32 %v3141_v16 }
0x2bd3   :  { %v3924_v24 = vpop.eup %3923 }
0x2bd4   :  { %v3143_v27 = vsel %vm3136_vm5, %v3924_v24, 0.0 }
0x2bd5   :  { %3144 = vadd.xlane.f32.xlu1 %v3143_v27 }
0x2bd6   :  { %4070 = shalt.err (!%p4067_p10)
}
0x2bd7   :  { %s4071_s8 = scalar_lea.hbm %s4877_s16, 16 }
0x2bd8   :  { %p4072_p11 = scmp.ne.s32.totalorder %s4877_s16, %s4071_s8  ;;  %p4075_p12 = scmp.lt.u32.totalorder %s4071_s8, %s4877_s16 }
0x2bda   :  { %p4077_p13 = pnand %p4075_p12, %p4072_p11 }
0x2bdc   :  { %4080 = shalt.err (!%p4077_p13)
}
0x2bdd   :  { %3169 = dma.vmem_to_hbm [thread:$0]  %s3167_s21, 16, %s4877_s16, [#allocation16]  }
0x2bde   :  { %s4155_s11 = smov [#allocation17]  }
0x2bdf   :  { %s3176_s22 = sshll.u32 %s4155_s11, 4  ;;  %s3177_s22 = int_to_ptr.vmem [resolvable:$true] %s3176_s22 }
0x2be0   :  { %s4081_s2 = scalar_lea.vmem %s3177_s22, 128  ;;  %p4086_p1 = scmp.lt.s32.totalorder %s3177_s22, %s3177_s22 }
0x2be1   :  { %p4082_p0 = scmp.ne.s32.totalorder %s3177_s22, %s4081_s2  ;;  %p4087_p2 = scmp.lt.s32.totalorder %s4081_s2, %s4081_s2 }
0x2be3   :  { %p4088_p3 = por %p4087_p2, %p4086_p1 }
0x2be5   :  { %p4089_p4 = pnand %p4088_p3, %p4082_p0 }
0x2be7   :  { %4092 = shalt.err (!%p4089_p4)
}
0x2be8   :  { %s4093_s9 = scalar_lea.hbm %s4878_s17, 128 }
0x2be9   :  { %p4094_p5 = scmp.ne.s32.totalorder %s4878_s17, %s4093_s9  ;;  %p4097_p6 = scmp.lt.u32.totalorder %s4093_s9, %s4878_s17 }
0x2beb   :  { %p4099_p7 = pnand %p4097_p6, %p4094_p5 }
0x2bed   :  { %4102 = shalt.err (!%p4099_p7)
}
0x2bee   :  { %3179 = dma.vmem_to_hbm [thread:$0]  %s3177_s22, 128, %s4878_s17, [#allocation16]  }
0x2bef   :  { %s4156_s23 = smov [#allocation14]  }
0x2bf0   :  { %s3156_s27 = sshll.u32 %s4156_s23, 4  ;;  %s3157_s27 = int_to_ptr.vmem [resolvable:$true] %s3156_s27 }
0x2bf1   :  { %s4103_s13 = scalar_lea.vmem %s3157_s27, 128  ;;  %p4108_p9 = scmp.lt.s32.totalorder %s3157_s27, %s3157_s27 }
0x2bf2   :  { %p4104_p8 = scmp.ne.s32.totalorder %s3157_s27, %s4103_s13  ;;  %p4109_p10 = scmp.lt.s32.totalorder %s4103_s13, %s4103_s13 }
0x2bf4   :  { %p4110_p11 = por %p4109_p10, %p4108_p9 }
0x2bf6   :  { %p4111_p12 = pnand %p4110_p11, %p4104_p8 }
0x2c62   :  { %v3145_v28 = vpop.xlane.xlu1 %3144 }
0x2c63   :  { %3925 = vlog2.f32 %v3145_v28 }
0x2c6d   :  { %v3926_v29 = vpop.eup %3925 }
0x2c6e   :  { %v3147_v25 = vmul.f32 0.6931472, %v3926_v29 }
0x2c70   :  { %v3148_v58 = vsub.f32 %v3140_v26, %v3147_v25 }
0x2c72   :  { %3149 = vst.msk [vmem:[#allocation14] sm:$0x3f] %vm3136_vm5, %v3148_v58 }
0x2c73   :  { %4114 = shalt.err (!%p4111_p12)
}
0x2c74   :  { %s4115_s17 = scalar_lea.hbm %s4876_s15, 128 }
0x2c75   :  { %p4116_p13 = scmp.ne.s32.totalorder %s4876_s15, %s4115_s17  ;;  %p4119_p0 = scmp.lt.u32.totalorder %s4115_s17, %s4876_s15 }
0x2c77   :  { %p4121_p1 = pnand %p4119_p0, %p4116_p13 }
0x2c79   :  { %4124 = shalt.err (!%p4121_p1)
}
0x2c7a   :  { %3159 = dma.vmem_to_hbm [thread:$0]  %s3157_s27, 128, %s4876_s15, [#allocation5]  }
0x2c7b   :  { %4133 = dma.done.wait [#allocation5], 128  }
0x2c7c   :  { %4134 = vsyncadd [#allocation5], 4294967168 }
0x2c7d   :  { %4135 = dma.done.wait [#allocation16], 144  }
0x2c7e   :  { %4136 = vsyncadd [#allocation16], 4294967152 }
0x2c7f   :  { %3189 = vsyncpa [#allocation4], 1 }
0x2c80   :  { %3190 = vsyncpa [#allocation7], 1 }
0x2c81   :  { %3191 = vsyncpa [#allocation10], 1 }
0x2c82   :  { %3192 = vsyncpa [#allocation13], 1 }
0x2c83   :  { %3193 = vsyncpa [#allocation5], 1 }
0x2c84   :  { %3194 = vsyncpa [#allocation16], 1 }

</bundles_post_ra>
